<compile_context>
chip_gen: v7x
topology: tpu7x:2x2x1
jax: 0.10.0
libtpu: 0.0.40
codegen_flags: <defaults>
</compile_context>

<pallas_src>
import functools

import jax
import jax.numpy as jnp
from jax.experimental import pallas as pl
from jax.experimental.pallas import tpu as pltpu

EPS = 1e-6
NEG_INF = -1e30   # additive causal mask value; only ever added to f32 scores


def _rms_normalize(v):
    """RMSNorm without the gain (gains are folded into the following weight matrix)."""
    ms = jnp.mean(v * v, axis=-1, keepdims=True)
    return v * jax.lax.rsqrt(ms + EPS)


# --------------------------------------------------------------------------------------
# Kernel 1: RMSNorm1 + QKV projection + RoPE
# --------------------------------------------------------------------------------------
def qkv_rope_kernel(x_ref, cos_ref, sins_ref, wqkv_ref, q_ref, k_ref, v_ref, *, n_head):
    cdt = wqkv_ref.dtype
    x = x_ref[0].astype(jnp.float32)                      # (T, C) residual tile, f32
    T, C = x.shape
    hd = C // n_head

    h = _rms_normalize(x).astype(cdt)                     # g1 folded into wqkv
    qkv = jnp.dot(h, wqkv_ref[...], preferred_element_type=jnp.float32)   # (T, 3C) f32

    cos = cos_ref[0]        # (T, hd) f32
    sins = sins_ref[0]      # (T, hd) f32, first half sign-flipped (rotate_half's negate)

    def heads(t2d):         # (T, C) -> (H, T, hd): one reshape + one transpose (no concat)
        return jnp.transpose(t2d.reshape(T, n_head, hd), (1, 0, 2))

    if hd % 128 == 0:
        # Lane-aligned head dim: rotate_half == roll by hd/2 with the sign folded into
        # `sins`, so the rotation goes to the (otherwise idle) XLU slot.
        def rope(t):        # t: (H, T, hd) f32
            return t * cos + pltpu.roll(t, shift=hd // 2, axis=2) * sins
    else:
        # Small / unaligned head dim: half-slice formula, one concat, no negate.
        def rope(t):
            h2 = hd // 2
            t1, t2 = t[..., :h2], t[..., h2:]
            return jnp.concatenate(
                [t1 * cos[:, :h2] + t2 * sins[:, :h2],
                 t2 * cos[:, h2:] + t1 * sins[:, h2:]], axis=-1)

    q_ref[0] = rope(heads(qkv[:, :C])).astype(cdt)        # softmax scale folded into wqkv
    k_ref[0] = rope(heads(qkv[:, C:2 * C])).astype(cdt)
    v_ref[0] = heads(qkv[:, 2 * C:]).astype(cdt)


# --------------------------------------------------------------------------------------
# Kernel 2: flash attention (causal, block-skipped) + proj + RMSNorm2 + SwiGLU FFN
# --------------------------------------------------------------------------------------
def attn_ffn_kernel(x_ref, q_ref, k_ref, v_ref, wproj_ref, wfc12_ref, wfc3_ref,
                    o_ref, m_sc, l_sc, acc_sc):
    cdt = wproj_ref.dtype
    qi = pl.program_id(1)
    kv = pl.program_id(2)

    @pl.when(kv == 0)
    def _init():
        m_sc[...] = jnp.full(m_sc.shape, -jnp.inf, m_sc.dtype)
        l_sc[...] = jnp.zeros(l_sc.shape, l_sc.dtype)
        acc_sc[...] = jnp.zeros(acc_sc.shape, acc_sc.dtype)

    def flash_step(masked):
        q = q_ref[0]                                      # (H, Tq, hd) compute dtype
        k = k_ref[0]                                      # (H, Tk, hd)
        v = v_ref[0]
        s = jnp.einsum('hqd,hkd->hqk', q, k,
                       preferred_element_type=jnp.float32)          # (H, Tq, Tk) f32
        if masked:
            # Only the diagonal block (qi == kv, Tq == Tk) needs the mask; the global
            # row/col offsets cancel, so the local lower-triangle test suffices.
            Tq, Tk = s.shape[1], s.shape[2]
            row = jax.lax.broadcasted_iota(jnp.int32, (Tq, Tk), 0)
            col = jax.lax.broadcasted_iota(jnp.int32, (Tq, Tk), 1)
            s = s + jnp.where(col <= row, jnp.float32(0.0), jnp.float32(NEG_INF))[None]
        m_prev = m_sc[...]
        m_new = jnp.maximum(m_prev, jnp.max(s, axis=-1, keepdims=True))
        alpha = jnp.exp(m_prev - m_new)
        p = jnp.exp(s - m_new)                            # unnormalized probabilities, f32
        l_sc[...] = alpha * l_sc[...] + jnp.sum(p, axis=-1, keepdims=True)
        acc_sc[...] = alpha * acc_sc[...] + jnp.einsum(
            'hqk,hkd->hqd', p.astype(cdt), v, preferred_element_type=jnp.float32)
        m_sc[...] = m_new

    # Causal block structure (Tq == Tk):
    #   kv > qi : fully above the diagonal -> no compute at all
    #   kv < qi : fully below the diagonal -> flash step without any mask work
    #   kv == qi: diagonal block           -> masked flash step, then finalize
    @pl.when(kv < qi)
    def _below():
        flash_step(masked=False)

    @pl.when(kv == qi)
    def _diag_and_finalize():
        flash_step(masked=True)

        # -------- finalize: proj + residual + RMSNorm2 + SwiGLU FFN + residual --------
        xr = x_ref[0].astype(jnp.float32)                           # (T, C)
        T, C = xr.shape
        o = (acc_sc[...] * (1.0 / l_sc[...])).astype(cdt)           # exact normalization
        attn = jnp.transpose(o, (1, 0, 2)).reshape(T, C)            # head merge (1 relayout)
        x1 = xr + jnp.dot(attn, wproj_ref[...], preferred_element_type=jnp.float32)

        h2 = _rms_normalize(x1).astype(cdt)                         # g2 folded into wfc12
        y = jnp.dot(h2, wfc12_ref[...], preferred_element_type=jnp.float32)   # (T, 2*dff)
        dff = y.shape[-1] // 2
        a, g = y[:, :dff], y[:, dff:]
        z = (a * (g * jax.nn.sigmoid(g))).astype(cdt)               # SwiGLU, f32 -> cdt
        ffn = jnp.dot(z, wfc3_ref[...], preferred_element_type=jnp.float32)
        o_ref[0] = (x1 + ffn).astype(o_ref.dtype)


# --------------------------------------------------------------------------------------
# Parameter preparation (call once, not per forward)
# --------------------------------------------------------------------------------------
def prepare_params(raw, *, n_head):
    """Fold RMSNorm gains into the rows of the following weight matrices and the
    softmax 1/sqrt(hd) scale into the Q columns of wqkv (RoPE is linear, so scaling
    before the rotation is exact)."""
    wqkv = raw["wqkv"]
    wdt = wqkv.dtype
    C = wqkv.shape[0]
    hd = C // n_head
    g1 = raw["g1"].astype(jnp.float32)[:, None]
    g2 = raw["g2"].astype(jnp.float32)[:, None]
    col_scale = jnp.ones((3 * C,), jnp.float32).at[:C].set(hd ** -0.5)[None, :]
    return {
        "wqkv": (wqkv.astype(jnp.float32) * g1 * col_scale).astype(wdt),
        "wproj": raw["wproj"],
        "wfc12": (raw["wfc12"].astype(jnp.float32) * g2).astype(raw["wfc12"].dtype),
        "wfc3": raw["wfc3"],
    }


def rope_tables(position_ids, head_dim, rope_theta):
    """HF-llama rotary tables in f32: cos (B,N,hd) and a sign-folded sin (first half
    negated) so that rotate_half(t)*sin == roll(t, hd/2)*sin_signed."""
    inv_freq = 1.0 / (rope_theta ** (jnp.arange(0, head_dim, 2, dtype=jnp.float32) / head_dim))
    freqs = position_ids.astype(jnp.float32)[:, :, None] * inv_freq[None, None, :]  # (B,N,hd/2)
    cos_h, sin_h = jnp.cos(freqs), jnp.sin(freqs)
    cos = jnp.concatenate([cos_h, cos_h], axis=-1)
    sin_signed = jnp.concatenate([-sin_h, sin_h], axis=-1)
    return cos, sin_signed


def _row_tile(n):
    """Largest TPU-friendly tile (multiple of 128, v6e-friendly 256 preferred) that
    divides N; otherwise the full extent."""
    for t in (256, 512, 128, 1024):
        if n % t == 0:
            return t
    return n


def _physical_vmem_bytes():
    # Build-time hardware query only (picks a default cap); never changes kernel structure.
    try:
        return int(pltpu.get_tpu_info().vmem_capacity_bytes)
    except Exception:
        return 128 * 1024 * 1024


def _vmem_limit(estimate_bytes):
    cap = (_physical_vmem_bytes() * 7) // 8          # ~112 MiB on v5e/v6e, ~56 MiB on v7x
    return int(min(cap, max(32 * 1024 * 1024, 2 * estimate_bytes + (16 << 20))))


# --------------------------------------------------------------------------------------
# Forward wrapper
# --------------------------------------------------------------------------------------
def block_forward(x, position_ids, params, *, n_head, rope_theta, row_tile=None):
    """Forward pass of Block.  `params` must come from prepare_params()."""
    B, N, C = x.shape
    assert C % n_head == 0
    hd = C // n_head
    assert hd % 2 == 0
    T = row_tile if row_tile is not None else _row_tile(N)
    assert N % T == 0
    nT = N // T

    wqkv, wproj = params["wqkv"], params["wproj"]
    wfc12, wfc3 = params["wfc12"], params["wfc3"]
    dff = wfc3.shape[0]
    cdt = wqkv.dtype
    wbytes = jnp.dtype(cdt).itemsize
    xbytes = jnp.dtype(x.dtype).itemsize

    cos, sin_signed = rope_tables(position_ids, hd, rope_theta)       # (B, N, hd) f32

    # ----------------------- kernel 1: RMSNorm1 + QKV + RoPE -----------------------
    est1 = (2 * wqkv.size * wbytes                     # resident weight (2 pipeline bufs)
            + 2 * (T * C * xbytes + 2 * T * hd * 4)    # x / cos / sin blocks
            + 2 * 3 * T * C * wbytes                   # q/k/v output blocks
            + 10 * T * 3 * C * 4)                      # f32 intermediates (qkv slab, RoPE)
    qkv_call = pl.pallas_call(
        functools.partial(qkv_rope_kernel, n_head=n_head),
        out_shape=tuple(jax.ShapeDtypeStruct((B, n_head, N, hd), cdt) for _ in range(3)),
        grid=(B, nT),
        in_specs=[
            pl.BlockSpec((1, T, C), lambda b, r: (b, r, 0)),          # x
            pl.BlockSpec((1, T, hd), lambda b, r: (b, r, 0)),         # cos
            pl.BlockSpec((1, T, hd), lambda b, r: (b, r, 0)),         # sin (sign-folded)
            pl.BlockSpec((C, 3 * C), lambda b, r: (0, 0)),            # wqkv (constant block)
        ],
        out_specs=tuple(pl.BlockSpec((1, n_head, T, hd), lambda b, r: (b, 0, r, 0))
                        for _ in range(3)),
        compiler_params=pltpu.CompilerParams(
            dimension_semantics=("parallel", "parallel"),
            vmem_limit_bytes=_vmem_limit(est1)),
    )
    q, k, v = qkv_call(x, cos, sin_signed, wqkv)

    # ------------- kernel 2: flash attention + proj + RMSNorm2 + SwiGLU FFN -------------
    est2 = (2 * (wproj.size + wfc12.size + wfc3.size) * wbytes        # resident weights
            + 2 * (2 * T * C * xbytes + 3 * T * C * wbytes)           # x/out + q/k/v blocks
            + n_head * T * (hd + 2) * 4                               # flash scratch (f32)
            + 4 * n_head * T * T * 4                                  # s/p tiles (f32)
            + 6 * T * max(C, 2 * dff) * 4)                            # f32 matmul temps
    block_call = pl.pallas_call(
        attn_ffn_kernel,
        out_shape=jax.ShapeDtypeStruct((B, N, C), x.dtype),
        grid=(B, nT, nT),
        in_specs=[
            pl.BlockSpec((1, T, C), lambda b, i, j: (b, i, 0)),                # x (residual)
            pl.BlockSpec((1, n_head, T, hd), lambda b, i, j: (b, 0, i, 0)),    # q (q-tile)
            pl.BlockSpec((1, n_head, T, hd), lambda b, i, j: (b, 0, j, 0)),    # k (kv-tile)
            pl.BlockSpec((1, n_head, T, hd), lambda b, i, j: (b, 0, j, 0)),    # v (kv-tile)
            pl.BlockSpec((C, C), lambda b, i, j: (0, 0)),                      # wproj
            pl.BlockSpec((C, 2 * dff), lambda b, i, j: (0, 0)),                # wfc12 (g2 folded)
            pl.BlockSpec((dff, C), lambda b, i, j: (0, 0)),                    # wfc3
        ],
        out_specs=pl.BlockSpec((1, T, C), lambda b, i, j: (b, i, 0)),
        scratch_shapes=[
            pltpu.VMEM((n_head, T, 1), jnp.float32),     # running max
            pltpu.VMEM((n_head, T, 1), jnp.float32),     # running sum
            pltpu.VMEM((n_head, T, hd), jnp.float32),    # unnormalized output accumulator
        ],
        compiler_params=pltpu.CompilerParams(
            dimension_semantics=("parallel", "parallel", "arbitrary"),
            vmem_limit_bytes=_vmem_limit(est2)),
    )
    return block_call(x, q, k, v, wproj, wfc12, wfc3)


# --------------------------------------------------------------------------------------
# Pure-JAX reference (mirrors the PyTorch module, uses the RAW/unfolded parameters;
# casts to the weight dtype at the same MXU boundaries as the kernel).
# --------------------------------------------------------------------------------------
def block_reference(x, position_ids, raw, *, n_head, rope_theta):
    B, N, C = x.shape
    hd = C // n_head
    cdt = raw["wqkv"].dtype
    inv_freq = 1.0 / (rope_theta ** (jnp.arange(0, hd, 2, dtype=jnp.float32) / hd))
    freqs = position_ids.astype(jnp.float32)[:, :, None] * inv_freq[None, None, :]
    emb = jnp.concatenate([freqs, freqs], axis=-1)
    cos, sin = jnp.cos(emb)[:, None], jnp.sin(emb)[:, None]            # (B,1,N,hd)

    def rms(v, g):
        ms = jnp.mean(v * v, axis=-1, keepdims=True)
        return v * jax.lax.rsqrt(ms + EPS) * g.astype(jnp.float32)

    def mm(a, w):
        return jnp.dot(a.astype(cdt), w, preferred_element_type=jnp.float32)

    def rotate_half(t):
        h = t.shape[-1] // 2
        return jnp.concatenate([-t[..., h:], t[..., :h]], axis=-1)

    xf = x.astype(jnp.float32)
    qkv = mm(rms(xf, raw["g1"]), raw["wqkv"])                          # (B, N, 3C) f32
    q = qkv[..., :C].reshape(B, N, n_head, hd).transpose(0, 2, 1, 3)
    k = qkv[..., C:2 * C].reshape(B, N, n_head, hd).transpose(0, 2, 1, 3)
    v = qkv[..., 2 * C:].reshape(B, N, n_head, hd).transpose(0, 2, 1, 3)
    q = (q * cos + rotate_half(q) * sin) * (hd ** -0.5)
    k = k * cos + rotate_half(k) * sin

    s = jnp.einsum("bhqd,bhkd->bhqk", q.astype(cdt), k.astype(cdt),
                   preferred_element_type=jnp.float32)
    s = jnp.where(jnp.tril(jnp.ones((N, N), dtype=bool)), s, NEG_INF)
    p = jax.nn.softmax(s, axis=-1)
    o = jnp.einsum("bhqk,bhkd->bhqd", p.astype(cdt), v.astype(cdt),
                   preferred_element_type=jnp.float32)
    xf = xf + mm(o.transpose(0, 2, 1, 3).reshape(B, N, C), raw["wproj"])

    y = mm(rms(xf, raw["g2"]), raw["wfc12"])
    dff = y.shape[-1] // 2
    z = y[..., :dff] * jax.nn.silu(y[..., dff:])
    xf = xf + mm(z, raw["wfc3"])
    return xf.astype(x.dtype)


# --------------------------------------------------------------------------------------
if __name__ == "__main__":
    ROPE_THETA = 10000.0

    def make_inputs(key, B, N, C, n_head, d_hidden, dtype):
        ks = jax.random.split(key, 7)
        x = jax.random.normal(ks[0], (B, N, C), jnp.float32).astype(dtype)
        position_ids = jnp.broadcast_to(jnp.arange(N, dtype=jnp.int32)[None, :], (B, N))
        raw = {
            "g1": (1.0 + 0.1 * jax.random.normal(ks[1], (C,), jnp.float32)).astype(dtype),
            "g2": (1.0 + 0.1 * jax.random.normal(ks[2], (C,), jnp.float32)).astype(dtype),
            "wqkv": (0.05 * jax.random.normal(ks[3], (C, 3 * C), jnp.float32)).astype(dtype),
            "wproj": (0.05 * jax.random.normal(ks[4], (C, C), jnp.float32)).astype(dtype),
            "wfc12": (0.05 * jax.random.normal(ks[5], (C, 2 * d_hidden), jnp.float32)).astype(dtype),
            "wfc3": (0.05 * jax.random.normal(ks[6], (d_hidden, C), jnp.float32)).astype(dtype),
        }
        return x, position_ids, raw

    def check(key, *, B, N, C, n_head, d_hidden, dtype, atol, rtol):
        x, pid, raw = make_inputs(key, B, N, C, n_head, d_hidden, dtype)
        params = prepare_params(raw, n_head=n_head)        # one-time weight folding
        fwd = jax.jit(functools.partial(block_forward, n_head=n_head, rope_theta=ROPE_THETA))
        out = jax.block_until_ready(fwd(x, pid, params))
        ref = block_reference(x, pid, raw, n_head=n_head, rope_theta=ROPE_THETA)
        assert out.shape == x.shape and out.dtype == x.dtype
        err = float(jnp.max(jnp.abs(out.astype(jnp.float32) - ref.astype(jnp.float32))))
        assert jnp.allclose(out.astype(jnp.float32), ref.astype(jnp.float32),
                            atol=atol, rtol=rtol), err

    # 1) small f32 shapes consistent with the module (single tile, masked diagonal path)
    check(jax.random.PRNGKey(0), B=2, N=8, C=32, n_head=4, d_hidden=64,
          dtype=jnp.float32, atol=2e-3, rtol=2e-3)
    # 2) bf16 weights/activations at TPU-aligned shapes (hd=128 -> pltpu.roll RoPE path)
    check(jax.random.PRNGKey(1), B=2, N=128, C=256, n_head=2, d_hidden=256,
          dtype=jnp.bfloat16, atol=4e-2, rtol=4e-2)
    # 3) multi-tile flash path: 2 q-tiles x 2 kv-tiles exercises causal block skipping,
    #    the unmasked below-diagonal step and the masked diagonal step
    check(jax.random.PRNGKey(2), B=2, N=512, C=256, n_head=2, d_hidden=256,
          dtype=jnp.bfloat16, atol=4e-2, rtol=4e-2)

    print("KERNEL_OK")
</pallas_src>

<mosaic_0001>
module attributes {stable_mosaic.version = 11 : i64} {
  func.func @qkv_rope_kernel(%arg0: i32, %arg1: i32, %arg2: memref<1x8x32xf32, #tpu.memory_space<vmem>>, %arg3: memref<1x8x8xf32, #tpu.memory_space<vmem>>, %arg4: memref<1x8x8xf32, #tpu.memory_space<vmem>>, %arg5: memref<32x96xf32, #tpu.memory_space<vmem>>, %arg6: memref<1x4x8x8xf32, #tpu.memory_space<vmem>>, %arg7: memref<1x4x8x8xf32, #tpu.memory_space<vmem>>, %arg8: memref<1x4x8x8xf32, #tpu.memory_space<vmem>>) attributes {dimension_semantics = [#tpu.dimension_semantics<parallel>, #tpu.dimension_semantics<parallel>], iteration_bounds = array<i64: 2, 1>, scalar_prefetch = 0 : i64, scratch_operands = 0 : i64, tpu.core_type = #tpu.core_type<tc>, window_params = [{transform_indices = @transform_0, window_bounds = array<i64: 1, 8, 32>}, {transform_indices = @transform_1, window_bounds = array<i64: 1, 8, 8>}, {transform_indices = @transform_2, window_bounds = array<i64: 1, 8, 8>}, {pipeline_mode = #tpu.pipeline_mode<synchronous>, transform_indices = @transform_3, window_bounds = array<i64: 32, 96>}, {transform_indices = @transform_4, window_bounds = array<i64: 1, 4, 8, 8>}, {transform_indices = @transform_5, window_bounds = array<i64: 1, 4, 8, 8>}, {transform_indices = @transform_6, window_bounds = array<i64: 1, 4, 8, 8>}]} {
    %c0 = arith.constant 0 : index
    %c0_0 = arith.constant 0 : index
    %c0_1 = arith.constant 0 : index
    %0 = vector.load %arg2[%c0, %c0_0, %c0_1] : memref<1x8x32xf32, #tpu.memory_space<vmem>>, vector<1x8x32xf32>
    %1 = vector.shape_cast %0 : vector<1x8x32xf32> to vector<8x32xf32>
    %2 = arith.mulf %1, %1 : vector<8x32xf32>
    %cst = arith.constant dense<0.000000e+00> : vector<8xf32>
    %3 = vector.multi_reduction <add>, %2, %cst [1] : vector<8x32xf32> to vector<8xf32>
    %4 = vector.shape_cast %3 : vector<8xf32> to vector<8x1xf32>
    %cst_2 = arith.constant 3.200000e+01 : f32
    %5 = vector.broadcast %cst_2 : f32 to vector<8x1xf32>
    %6 = arith.divf %4, %5 : vector<8x1xf32>
    %cst_3 = arith.constant 9.99999997E-7 : f32
    %7 = vector.broadcast %cst_3 : f32 to vector<8x1xf32>
    %8 = arith.addf %6, %7 : vector<8x1xf32>
    %9 = math.rsqrt %8 : vector<8x1xf32>
    %10 = vector.broadcast %9 : vector<8x1xf32> to vector<8x32xf32>
    %11 = arith.mulf %1, %10 : vector<8x32xf32>
    %c0_4 = arith.constant 0 : index
    %c0_5 = arith.constant 0 : index
    %12 = vector.load %arg5[%c0_4, %c0_5] : memref<32x96xf32, #tpu.memory_space<vmem>>, vector<32x96xf32>
    %cst_6 = arith.constant dense<0.000000e+00> : vector<8x96xf32>
    %13 = tpu.matmul %11, %12, %cst_6 {dimension_numbers = #tpu.dot_dimension_numbers<[1], [0], [0], [1], [0, 0, 1, 1], [], []>} : vector<8x32xf32>, vector<32x96xf32>, vector<8x96xf32> -> vector<8x96xf32>
    %c0_7 = arith.constant 0 : index
    %c0_8 = arith.constant 0 : index
    %c0_9 = arith.constant 0 : index
    %14 = vector.load %arg3[%c0_7, %c0_8, %c0_9] : memref<1x8x8xf32, #tpu.memory_space<vmem>>, vector<1x8x8xf32>
    %15 = vector.shape_cast %14 : vector<1x8x8xf32> to vector<8x8xf32>
    %c0_10 = arith.constant 0 : index
    %c0_11 = arith.constant 0 : index
    %c0_12 = arith.constant 0 : index
    %16 = vector.load %arg4[%c0_10, %c0_11, %c0_12] : memref<1x8x8xf32, #tpu.memory_space<vmem>>, vector<1x8x8xf32>
    %17 = vector.shape_cast %16 : vector<1x8x8xf32> to vector<8x8xf32>
    %18 = vector.extract_strided_slice %13 {offsets = [0, 0], sizes = [8, 32], strides = [1, 1]} : vector<8x96xf32> to vector<8x32xf32>
    %19 = vector.shape_cast %18 : vector<8x32xf32> to vector<8x4x8xf32>
    %20 = tpu.transpose %19, [1, 0, 2] : vector<8x4x8xf32> -> vector<4x8x8xf32>
    %21 = vector.extract_strided_slice %20 {offsets = [0, 0, 0], sizes = [4, 8, 4], strides = [1, 1, 1]} : vector<4x8x8xf32> to vector<4x8x4xf32>
    %22 = vector.extract_strided_slice %20 {offsets = [0, 0, 4], sizes = [4, 8, 4], strides = [1, 1, 1]} : vector<4x8x8xf32> to vector<4x8x4xf32>
    %23 = vector.extract_strided_slice %15 {offsets = [0, 0], sizes = [8, 4], strides = [1, 1]} : vector<8x8xf32> to vector<8x4xf32>
    %24 = vector.shape_cast %23 : vector<8x4xf32> to vector<1x8x4xf32>
    %25 = vector.broadcast %24 : vector<1x8x4xf32> to vector<4x8x4xf32>
    %26 = arith.mulf %21, %25 : vector<4x8x4xf32>
    %27 = vector.extract_strided_slice %17 {offsets = [0, 0], sizes = [8, 4], strides = [1, 1]} : vector<8x8xf32> to vector<8x4xf32>
    %28 = vector.shape_cast %27 : vector<8x4xf32> to vector<1x8x4xf32>
    %29 = vector.broadcast %28 : vector<1x8x4xf32> to vector<4x8x4xf32>
    %30 = arith.mulf %22, %29 : vector<4x8x4xf32>
    %31 = arith.addf %26, %30 : vector<4x8x4xf32>
    %32 = vector.extract_strided_slice %15 {offsets = [0, 4], sizes = [8, 4], strides = [1, 1]} : vector<8x8xf32> to vector<8x4xf32>
    %33 = vector.shape_cast %32 : vector<8x4xf32> to vector<1x8x4xf32>
    %34 = vector.broadcast %33 : vector<1x8x4xf32> to vector<4x8x4xf32>
    %35 = arith.mulf %22, %34 : vector<4x8x4xf32>
    %36 = vector.extract_strided_slice %17 {offsets = [0, 4], sizes = [8, 4], strides = [1, 1]} : vector<8x8xf32> to vector<8x4xf32>
    %37 = vector.shape_cast %36 : vector<8x4xf32> to vector<1x8x4xf32>
    %38 = vector.broadcast %37 : vector<1x8x4xf32> to vector<4x8x4xf32>
    %39 = arith.mulf %21, %38 : vector<4x8x4xf32>
    %40 = arith.addf %35, %39 : vector<4x8x4xf32>
    %41 = tpu.concatenate %31, %40 in 2 : vector<4x8x4xf32>, vector<4x8x4xf32> -> vector<4x8x8xf32>
    %c0_13 = arith.constant 0 : index
    %c0_14 = arith.constant 0 : index
    %c0_15 = arith.constant 0 : index
    %c0_16 = arith.constant 0 : index
    %42 = vector.load %arg6[%c0_13, %c0_14, %c0_15, %c0_16] : memref<1x4x8x8xf32, #tpu.memory_space<vmem>>, vector<1x4x8x8xf32>
    %43 = vector.shape_cast %42 : vector<1x4x8x8xf32> to vector<4x8x8xf32>
    %44 = vector.shape_cast %41 : vector<4x8x8xf32> to vector<1x4x8x8xf32>
    tpu.vector_store %arg6[%c0_13, %c0_14, %c0_15, %c0_16], %44 {strides = array<i32>} : memref<1x4x8x8xf32, #tpu.memory_space<vmem>>, vector<1x4x8x8xf32>,
    %45 = vector.extract_strided_slice %13 {offsets = [0, 32], sizes = [8, 32], strides = [1, 1]} : vector<8x96xf32> to vector<8x32xf32>
    %46 = vector.shape_cast %45 : vector<8x32xf32> to vector<8x4x8xf32>
    %47 = tpu.transpose %46, [1, 0, 2] : vector<8x4x8xf32> -> vector<4x8x8xf32>
    %48 = vector.extract_strided_slice %47 {offsets = [0, 0, 0], sizes = [4, 8, 4], strides = [1, 1, 1]} : vector<4x8x8xf32> to vector<4x8x4xf32>
    %49 = vector.extract_strided_slice %47 {offsets = [0, 0, 4], sizes = [4, 8, 4], strides = [1, 1, 1]} : vector<4x8x8xf32> to vector<4x8x4xf32>
    %50 = vector.extract_strided_slice %15 {offsets = [0, 0], sizes = [8, 4], strides = [1, 1]} : vector<8x8xf32> to vector<8x4xf32>
    %51 = vector.shape_cast %50 : vector<8x4xf32> to vector<1x8x4xf32>
    %52 = vector.broadcast %51 : vector<1x8x4xf32> to vector<4x8x4xf32>
    %53 = arith.mulf %48, %52 : vector<4x8x4xf32>
    %54 = vector.extract_strided_slice %17 {offsets = [0, 0], sizes = [8, 4], strides = [1, 1]} : vector<8x8xf32> to vector<8x4xf32>
    %55 = vector.shape_cast %54 : vector<8x4xf32> to vector<1x8x4xf32>
    %56 = vector.broadcast %55 : vector<1x8x4xf32> to vector<4x8x4xf32>
    %57 = arith.mulf %49, %56 : vector<4x8x4xf32>
    %58 = arith.addf %53, %57 : vector<4x8x4xf32>
    %59 = vector.extract_strided_slice %15 {offsets = [0, 4], sizes = [8, 4], strides = [1, 1]} : vector<8x8xf32> to vector<8x4xf32>
    %60 = vector.shape_cast %59 : vector<8x4xf32> to vector<1x8x4xf32>
    %61 = vector.broadcast %60 : vector<1x8x4xf32> to vector<4x8x4xf32>
    %62 = arith.mulf %49, %61 : vector<4x8x4xf32>
    %63 = vector.extract_strided_slice %17 {offsets = [0, 4], sizes = [8, 4], strides = [1, 1]} : vector<8x8xf32> to vector<8x4xf32>
    %64 = vector.shape_cast %63 : vector<8x4xf32> to vector<1x8x4xf32>
    %65 = vector.broadcast %64 : vector<1x8x4xf32> to vector<4x8x4xf32>
    %66 = arith.mulf %48, %65 : vector<4x8x4xf32>
    %67 = arith.addf %62, %66 : vector<4x8x4xf32>
    %68 = tpu.concatenate %58, %67 in 2 : vector<4x8x4xf32>, vector<4x8x4xf32> -> vector<4x8x8xf32>
    %c0_17 = arith.constant 0 : index
    %c0_18 = arith.constant 0 : index
    %c0_19 = arith.constant 0 : index
    %c0_20 = arith.constant 0 : index
    %69 = vector.load %arg7[%c0_17, %c0_18, %c0_19, %c0_20] : memref<1x4x8x8xf32, #tpu.memory_space<vmem>>, vector<1x4x8x8xf32>
    %70 = vector.shape_cast %69 : vector<1x4x8x8xf32> to vector<4x8x8xf32>
    %71 = vector.shape_cast %68 : vector<4x8x8xf32> to vector<1x4x8x8xf32>
    tpu.vector_store %arg7[%c0_17, %c0_18, %c0_19, %c0_20], %71 {strides = array<i32>} : memref<1x4x8x8xf32, #tpu.memory_space<vmem>>, vector<1x4x8x8xf32>,
    %72 = vector.extract_strided_slice %13 {offsets = [0, 64], sizes = [8, 32], strides = [1, 1]} : vector<8x96xf32> to vector<8x32xf32>
    %73 = vector.shape_cast %72 : vector<8x32xf32> to vector<8x4x8xf32>
    %74 = tpu.transpose %73, [1, 0, 2] : vector<8x4x8xf32> -> vector<4x8x8xf32>
    %c0_21 = arith.constant 0 : index
    %c0_22 = arith.constant 0 : index
    %c0_23 = arith.constant 0 : index
    %c0_24 = arith.constant 0 : index
    %75 = vector.load %arg8[%c0_21, %c0_22, %c0_23, %c0_24] : memref<1x4x8x8xf32, #tpu.memory_space<vmem>>, vector<1x4x8x8xf32>
    %76 = vector.shape_cast %75 : vector<1x4x8x8xf32> to vector<4x8x8xf32>
    %77 = vector.shape_cast %74 : vector<4x8x8xf32> to vector<1x4x8x8xf32>
    tpu.vector_store %arg8[%c0_21, %c0_22, %c0_23, %c0_24], %77 {strides = array<i32>} : memref<1x4x8x8xf32, #tpu.memory_space<vmem>>, vector<1x4x8x8xf32>,
    return
  }
  func.func @transform_0(%arg0: i32, %arg1: i32) -> (i32, i32, i32) {
    %c0_i32 = arith.constant 0 : i32
    %c0_i32_0 = arith.constant 0 : i32
    return %arg0, %arg1, %c0_i32 : i32, i32, i32
  }
  func.func @transform_1(%arg0: i32, %arg1: i32) -> (i32, i32, i32) {
    %c0_i32 = arith.constant 0 : i32
    %c0_i32_0 = arith.constant 0 : i32
    return %arg0, %arg1, %c0_i32 : i32, i32, i32
  }
  func.func @transform_2(%arg0: i32, %arg1: i32) -> (i32, i32, i32) {
    %c0_i32 = arith.constant 0 : i32
    %c0_i32_0 = arith.constant 0 : i32
    return %arg0, %arg1, %c0_i32 : i32, i32, i32
  }
  func.func @transform_3(%arg0: i32, %arg1: i32) -> (i32, i32) {
    %c0_i32 = arith.constant 0 : i32
    %c0_i32_0 = arith.constant 0 : i32
    %c0_i32_1 = arith.constant 0 : i32
    return %c0_i32, %c0_i32_0 : i32, i32
  }
  func.func @transform_4(%arg0: i32, %arg1: i32) -> (i32, i32, i32, i32) {
    %c0_i32 = arith.constant 0 : i32
    %c0_i32_0 = arith.constant 0 : i32
    %c0_i32_1 = arith.constant 0 : i32
    return %arg0, %c0_i32, %arg1, %c0_i32_0 : i32, i32, i32, i32
  }
  func.func @transform_5(%arg0: i32, %arg1: i32) -> (i32, i32, i32, i32) {
    %c0_i32 = arith.constant 0 : i32
    %c0_i32_0 = arith.constant 0 : i32
    %c0_i32_1 = arith.constant 0 : i32
    return %arg0, %c0_i32, %arg1, %c0_i32_0 : i32, i32, i32, i32
  }
  func.func @transform_6(%arg0: i32, %arg1: i32) -> (i32, i32, i32, i32) {
    %c0_i32 = arith.constant 0 : i32
    %c0_i32_0 = arith.constant 0 : i32
    %c0_i32_1 = arith.constant 0 : i32
    return %arg0, %c0_i32, %arg1, %c0_i32_0 : i32, i32, i32, i32
  }
}

module attributes {stable_mosaic.version = 11 : i64} {
  func.func @attn_ffn_kernel(%arg0: i32, %arg1: i32, %arg2: i32, %arg3: memref<1x8x32xf32, #tpu.memory_space<vmem>>, %arg4: memref<1x4x8x8xf32, #tpu.memory_space<vmem>>, %arg5: memref<1x4x8x8xf32, #tpu.memory_space<vmem>>, %arg6: memref<1x4x8x8xf32, #tpu.memory_space<vmem>>, %arg7: memref<32x32xf32, #tpu.memory_space<vmem>>, %arg8: memref<32x128xf32, #tpu.memory_space<vmem>>, %arg9: memref<64x32xf32, #tpu.memory_space<vmem>>, %arg10: memref<1x8x32xf32, #tpu.memory_space<vmem>>, %arg11: memref<4x8x1xf32, #tpu.memory_space<vmem>>, %arg12: memref<4x8x1xf32, #tpu.memory_space<vmem>>, %arg13: memref<4x8x8xf32, #tpu.memory_space<vmem>>) attributes {dimension_semantics = [#tpu.dimension_semantics<parallel>, #tpu.dimension_semantics<parallel>, #tpu.dimension_semantics<arbitrary>], iteration_bounds = array<i64: 2, 1, 1>, scalar_prefetch = 0 : i64, scratch_operands = 3 : i64, tpu.core_type = #tpu.core_type<tc>, window_params = [{transform_indices = @transform_0, window_bounds = array<i64: 1, 8, 32>}, {transform_indices = @transform_1, window_bounds = array<i64: 1, 4, 8, 8>}, {transform_indices = @transform_2, window_bounds = array<i64: 1, 4, 8, 8>}, {transform_indices = @transform_3, window_bounds = array<i64: 1, 4, 8, 8>}, {pipeline_mode = #tpu.pipeline_mode<synchronous>, transform_indices = @transform_4, window_bounds = array<i64: 32, 32>}, {pipeline_mode = #tpu.pipeline_mode<synchronous>, transform_indices = @transform_5, window_bounds = array<i64: 32, 128>}, {pipeline_mode = #tpu.pipeline_mode<synchronous>, transform_indices = @transform_6, window_bounds = array<i64: 64, 32>}, {transform_indices = @transform_7, window_bounds = array<i64: 1, 8, 32>}]} {
    %c0_i32 = arith.constant 0 : i32
    %0 = arith.cmpi eq, %arg2, %c0_i32 : i32
    %1 = arith.extui %0 : i1 to i32
    %c0_i32_0 = arith.constant 0 : i32
    %2 = arith.cmpi ne, %1, %c0_i32_0 : i32
    scf.if %2 {
      %cst = arith.constant 0xFF800000 : f32
      %9 = vector.broadcast %cst : f32 to vector<4x8x1xf32>
      %c0 = arith.constant 0 : index
      %c0_3 = arith.constant 0 : index
      %c0_4 = arith.constant 0 : index
      %10 = vector.load %arg11[%c0, %c0_3, %c0_4] : memref<4x8x1xf32, #tpu.memory_space<vmem>>, vector<4x8x1xf32>
      tpu.vector_store %arg11[%c0, %c0_3, %c0_4], %9 {strides = array<i32>} : memref<4x8x1xf32, #tpu.memory_space<vmem>>, vector<4x8x1xf32>,
      %cst_5 = arith.constant 0.000000e+00 : f32
      %11 = vector.broadcast %cst_5 : f32 to vector<4x8x1xf32>
      %c0_6 = arith.constant 0 : index
      %c0_7 = arith.constant 0 : index
      %c0_8 = arith.constant 0 : index
      %12 = vector.load %arg12[%c0_6, %c0_7, %c0_8] : memref<4x8x1xf32, #tpu.memory_space<vmem>>, vector<4x8x1xf32>
      tpu.vector_store %arg12[%c0_6, %c0_7, %c0_8], %11 {strides = array<i32>} : memref<4x8x1xf32, #tpu.memory_space<vmem>>, vector<4x8x1xf32>,
      %cst_9 = arith.constant 0.000000e+00 : f32
      %13 = vector.broadcast %cst_9 : f32 to vector<4x8x8xf32>
      %c0_10 = arith.constant 0 : index
      %c0_11 = arith.constant 0 : index
      %c0_12 = arith.constant 0 : index
      %14 = vector.load %arg13[%c0_10, %c0_11, %c0_12] : memref<4x8x8xf32, #tpu.memory_space<vmem>>, vector<4x8x8xf32>
      tpu.vector_store %arg13[%c0_10, %c0_11, %c0_12], %13 {strides = array<i32>} : memref<4x8x8xf32, #tpu.memory_space<vmem>>, vector<4x8x8xf32>,
    } else {
    }
    %3 = arith.cmpi slt, %arg2, %arg1 : i32
    %4 = arith.extui %3 : i1 to i32
    %c0_i32_1 = arith.constant 0 : i32
    %5 = arith.cmpi ne, %4, %c0_i32_1 : i32
    scf.if %5 {
      %c0 = arith.constant 0 : index
      %c0_3 = arith.constant 0 : index
      %c0_4 = arith.constant 0 : index
      %c0_5 = arith.constant 0 : index
      %9 = vector.load %arg4[%c0, %c0_3, %c0_4, %c0_5] : memref<1x4x8x8xf32, #tpu.memory_space<vmem>>, vector<1x4x8x8xf32>
      %10 = vector.shape_cast %9 : vector<1x4x8x8xf32> to vector<4x8x8xf32>
      %c0_6 = arith.constant 0 : index
      %c0_7 = arith.constant 0 : index
      %c0_8 = arith.constant 0 : index
      %c0_9 = arith.constant 0 : index
      %11 = vector.load %arg5[%c0_6, %c0_7, %c0_8, %c0_9] : memref<1x4x8x8xf32, #tpu.memory_space<vmem>>, vector<1x4x8x8xf32>
      %12 = vector.shape_cast %11 : vector<1x4x8x8xf32> to vector<4x8x8xf32>
      %c0_10 = arith.constant 0 : index
      %c0_11 = arith.constant 0 : index
      %c0_12 = arith.constant 0 : index
      %c0_13 = arith.constant 0 : index
      %13 = vector.load %arg6[%c0_10, %c0_11, %c0_12, %c0_13] : memref<1x4x8x8xf32, #tpu.memory_space<vmem>>, vector<1x4x8x8xf32>
      %14 = vector.shape_cast %13 : vector<1x4x8x8xf32> to vector<4x8x8xf32>
      "tpu.trace_start"() <{level = 10 : i32, message = "hqd,hkd->hqk"}> : () -> ()
      %cst = arith.constant dense<0.000000e+00> : vector<4x8x8xf32>
      %15 = tpu.matmul %10, %12, %cst {dimension_numbers = #tpu.dot_dimension_numbers<[2], [2], [1], [1], [0, 0, 0, 1, 1, 1], [0], [0]>} : vector<4x8x8xf32>, vector<4x8x8xf32>, vector<4x8x8xf32> -> vector<4x8x8xf32>
      "tpu.trace_stop"() : () -> ()
      %c0_14 = arith.constant 0 : index
      %c0_15 = arith.constant 0 : index
      %c0_16 = arith.constant 0 : index
      %16 = vector.load %arg11[%c0_14, %c0_15, %c0_16] : memref<4x8x1xf32, #tpu.memory_space<vmem>>, vector<4x8x1xf32>
      %cst_17 = arith.constant dense<0xFF800000> : vector<4x8xf32>
      %17 = vector.multi_reduction <maximumf>, %15, %cst_17 [2] : vector<4x8x8xf32> to vector<4x8xf32>
      %18 = vector.shape_cast %17 : vector<4x8xf32> to vector<4x8x1xf32>
      %19 = arith.maximumf %16, %18 : vector<4x8x1xf32>
      %20 = arith.subf %16, %19 : vector<4x8x1xf32>
      %21 = math.exp %20 : vector<4x8x1xf32>
      %22 = vector.broadcast %19 : vector<4x8x1xf32> to vector<4x8x8xf32>
      %23 = arith.subf %15, %22 : vector<4x8x8xf32>
      %24 = math.exp %23 : vector<4x8x8xf32>
      %c0_18 = arith.constant 0 : index
      %c0_19 = arith.constant 0 : index
      %c0_20 = arith.constant 0 : index
      %25 = vector.load %arg12[%c0_18, %c0_19, %c0_20] : memref<4x8x1xf32, #tpu.memory_space<vmem>>, vector<4x8x1xf32>
      %26 = arith.mulf %21, %25 : vector<4x8x1xf32>
      %cst_21 = arith.constant dense<0.000000e+00> : vector<4x8xf32>
      %27 = vector.multi_reduction <add>, %24, %cst_21 [2] : vector<4x8x8xf32> to vector<4x8xf32>
      %28 = vector.shape_cast %27 : vector<4x8xf32> to vector<4x8x1xf32>
      %29 = arith.addf %26, %28 : vector<4x8x1xf32>
      %c0_22 = arith.constant 0 : index
      %c0_23 = arith.constant 0 : index
      %c0_24 = arith.constant 0 : index
      %30 = vector.load %arg12[%c0_22, %c0_23, %c0_24] : memref<4x8x1xf32, #tpu.memory_space<vmem>>, vector<4x8x1xf32>
      tpu.vector_store %arg12[%c0_22, %c0_23, %c0_24], %29 {strides = array<i32>} : memref<4x8x1xf32, #tpu.memory_space<vmem>>, vector<4x8x1xf32>,
      %c0_25 = arith.constant 0 : index
      %c0_26 = arith.constant 0 : index
      %c0_27 = arith.constant 0 : index
      %31 = vector.load %arg13[%c0_25, %c0_26, %c0_27] : memref<4x8x8xf32, #tpu.memory_space<vmem>>, vector<4x8x8xf32>
      %32 = vector.broadcast %21 : vector<4x8x1xf32> to vector<4x8x8xf32>
      %33 = arith.mulf %32, %31 : vector<4x8x8xf32>
      "tpu.trace_start"() <{level = 10 : i32, message = "hqk,hkd->hqd"}> : () -> ()
      %cst_28 = arith.constant dense<0.000000e+00> : vector<4x8x8xf32>
      %34 = tpu.matmul %24, %14, %cst_28 {dimension_numbers = #tpu.dot_dimension_numbers<[2], [1], [1], [2], [0, 0, 0, 1, 1, 2], [0], [0]>} : vector<4x8x8xf32>, vector<4x8x8xf32>, vector<4x8x8xf32> -> vector<4x8x8xf32>
      "tpu.trace_stop"() : () -> ()
      %35 = arith.addf %33, %34 : vector<4x8x8xf32>
      %c0_29 = arith.constant 0 : index
      %c0_30 = arith.constant 0 : index
      %c0_31 = arith.constant 0 : index
      %36 = vector.load %arg13[%c0_29, %c0_30, %c0_31] : memref<4x8x8xf32, #tpu.memory_space<vmem>>, vector<4x8x8xf32>
      tpu.vector_store %arg13[%c0_29, %c0_30, %c0_31], %35 {strides = array<i32>} : memref<4x8x8xf32, #tpu.memory_space<vmem>>, vector<4x8x8xf32>,
      %c0_32 = arith.constant 0 : index
      %c0_33 = arith.constant 0 : index
      %c0_34 = arith.constant 0 : index
      %37 = vector.load %arg11[%c0_32, %c0_33, %c0_34] : memref<4x8x1xf32, #tpu.memory_space<vmem>>, vector<4x8x1xf32>
      tpu.vector_store %arg11[%c0_32, %c0_33, %c0_34], %19 {strides = array<i32>} : memref<4x8x1xf32, #tpu.memory_space<vmem>>, vector<4x8x1xf32>,
    } else {
    }
    %6 = arith.cmpi eq, %arg2, %arg1 : i32
    %7 = arith.extui %6 : i1 to i32
    %c0_i32_2 = arith.constant 0 : i32
    %8 = arith.cmpi ne, %7, %c0_i32_2 : i32
    scf.if %8 {
      %c0 = arith.constant 0 : index
      %c0_3 = arith.constant 0 : index
      %c0_4 = arith.constant 0 : index
      %c0_5 = arith.constant 0 : index
      %9 = vector.load %arg4[%c0, %c0_3, %c0_4, %c0_5] : memref<1x4x8x8xf32, #tpu.memory_space<vmem>>, vector<1x4x8x8xf32>
      %10 = vector.shape_cast %9 : vector<1x4x8x8xf32> to vector<4x8x8xf32>
      %c0_6 = arith.constant 0 : index
      %c0_7 = arith.constant 0 : index
      %c0_8 = arith.constant 0 : index
      %c0_9 = arith.constant 0 : index
      %11 = vector.load %arg5[%c0_6, %c0_7, %c0_8, %c0_9] : memref<1x4x8x8xf32, #tpu.memory_space<vmem>>, vector<1x4x8x8xf32>
      %12 = vector.shape_cast %11 : vector<1x4x8x8xf32> to vector<4x8x8xf32>
      %c0_10 = arith.constant 0 : index
      %c0_11 = arith.constant 0 : index
      %c0_12 = arith.constant 0 : index
      %c0_13 = arith.constant 0 : index
      %13 = vector.load %arg6[%c0_10, %c0_11, %c0_12, %c0_13] : memref<1x4x8x8xf32, #tpu.memory_space<vmem>>, vector<1x4x8x8xf32>
      %14 = vector.shape_cast %13 : vector<1x4x8x8xf32> to vector<4x8x8xf32>
      "tpu.trace_start"() <{level = 10 : i32, message = "hqd,hkd->hqk"}> : () -> ()
      %cst = arith.constant dense<0.000000e+00> : vector<4x8x8xf32>
      %15 = tpu.matmul %10, %12, %cst {dimension_numbers = #tpu.dot_dimension_numbers<[2], [2], [1], [1], [0, 0, 0, 1, 1, 1], [0], [0]>} : vector<4x8x8xf32>, vector<4x8x8xf32>, vector<4x8x8xf32> -> vector<4x8x8xf32>
      "tpu.trace_stop"() : () -> ()
      %16 = tpu.iota {dimensions = array<i32: 0>} : vector<8x8xi32>
      %17 = tpu.iota {dimensions = array<i32: 1>} : vector<8x8xi32>
      %18 = arith.cmpi sle, %17, %16 : vector<8x8xi32>
      %cst_14 = arith.constant 0.000000e+00 : f32
      %cst_15 = arith.constant -1.000000e+30 : f32
      %19 = vector.broadcast %cst_14 : f32 to vector<8x8xf32>
      %20 = vector.broadcast %cst_15 : f32 to vector<8x8xf32>
      %21 = arith.select %18, %19, %20 : vector<8x8xi1>, vector<8x8xf32>
      %22 = vector.shape_cast %21 : vector<8x8xf32> to vector<1x8x8xf32>
      %23 = vector.broadcast %22 : vector<1x8x8xf32> to vector<4x8x8xf32>
      %24 = arith.addf %15, %23 : vector<4x8x8xf32>
      %c0_16 = arith.constant 0 : index
      %c0_17 = arith.constant 0 : index
      %c0_18 = arith.constant 0 : index
      %25 = vector.load %arg11[%c0_16, %c0_17, %c0_18] : memref<4x8x1xf32, #tpu.memory_space<vmem>>, vector<4x8x1xf32>
      %cst_19 = arith.constant dense<0xFF800000> : vector<4x8xf32>
      %26 = vector.multi_reduction <maximumf>, %24, %cst_19 [2] : vector<4x8x8xf32> to vector<4x8xf32>
      %27 = vector.shape_cast %26 : vector<4x8xf32> to vector<4x8x1xf32>
      %28 = arith.maximumf %25, %27 : vector<4x8x1xf32>
      %29 = arith.subf %25, %28 : vector<4x8x1xf32>
      %30 = math.exp %29 : vector<4x8x1xf32>
      %31 = vector.broadcast %28 : vector<4x8x1xf32> to vector<4x8x8xf32>
      %32 = arith.subf %24, %31 : vector<4x8x8xf32>
      %33 = math.exp %32 : vector<4x8x8xf32>
      %c0_20 = arith.constant 0 : index
      %c0_21 = arith.constant 0 : index
      %c0_22 = arith.constant 0 : index
      %34 = vector.load %arg12[%c0_20, %c0_21, %c0_22] : memref<4x8x1xf32, #tpu.memory_space<vmem>>, vector<4x8x1xf32>
      %35 = arith.mulf %30, %34 : vector<4x8x1xf32>
      %cst_23 = arith.constant dense<0.000000e+00> : vector<4x8xf32>
      %36 = vector.multi_reduction <add>, %33, %cst_23 [2] : vector<4x8x8xf32> to vector<4x8xf32>
      %37 = vector.shape_cast %36 : vector<4x8xf32> to vector<4x8x1xf32>
      %38 = arith.addf %35, %37 : vector<4x8x1xf32>
      %c0_24 = arith.constant 0 : index
      %c0_25 = arith.constant 0 : index
      %c0_26 = arith.constant 0 : index
      %39 = vector.load %arg12[%c0_24, %c0_25, %c0_26] : memref<4x8x1xf32, #tpu.memory_space<vmem>>, vector<4x8x1xf32>
      tpu.vector_store %arg12[%c0_24, %c0_25, %c0_26], %38 {strides = array<i32>} : memref<4x8x1xf32, #tpu.memory_space<vmem>>, vector<4x8x1xf32>,
      %c0_27 = arith.constant 0 : index
      %c0_28 = arith.constant 0 : index
      %c0_29 = arith.constant 0 : index
      %40 = vector.load %arg13[%c0_27, %c0_28, %c0_29] : memref<4x8x8xf32, #tpu.memory_space<vmem>>, vector<4x8x8xf32>
      %41 = vector.broadcast %30 : vector<4x8x1xf32> to vector<4x8x8xf32>
      %42 = arith.mulf %41, %40 : vector<4x8x8xf32>
      "tpu.trace_start"() <{level = 10 : i32, message = "hqk,hkd->hqd"}> : () -> ()
      %cst_30 = arith.constant dense<0.000000e+00> : vector<4x8x8xf32>
      %43 = tpu.matmul %33, %14, %cst_30 {dimension_numbers = #tpu.dot_dimension_numbers<[2], [1], [1], [2], [0, 0, 0, 1, 1, 2], [0], [0]>} : vector<4x8x8xf32>, vector<4x8x8xf32>, vector<4x8x8xf32> -> vector<4x8x8xf32>
      "tpu.trace_stop"() : () -> ()
      %44 = arith.addf %42, %43 : vector<4x8x8xf32>
      %c0_31 = arith.constant 0 : index
      %c0_32 = arith.constant 0 : index
      %c0_33 = arith.constant 0 : index
      %45 = vector.load %arg13[%c0_31, %c0_32, %c0_33] : memref<4x8x8xf32, #tpu.memory_space<vmem>>, vector<4x8x8xf32>
      tpu.vector_store %arg13[%c0_31, %c0_32, %c0_33], %44 {strides = array<i32>} : memref<4x8x8xf32, #tpu.memory_space<vmem>>, vector<4x8x8xf32>,
      %c0_34 = arith.constant 0 : index
      %c0_35 = arith.constant 0 : index
      %c0_36 = arith.constant 0 : index
      %46 = vector.load %arg11[%c0_34, %c0_35, %c0_36] : memref<4x8x1xf32, #tpu.memory_space<vmem>>, vector<4x8x1xf32>
      tpu.vector_store %arg11[%c0_34, %c0_35, %c0_36], %28 {strides = array<i32>} : memref<4x8x1xf32, #tpu.memory_space<vmem>>, vector<4x8x1xf32>,
      %c0_37 = arith.constant 0 : index
      %c0_38 = arith.constant 0 : index
      %c0_39 = arith.constant 0 : index
      %47 = vector.load %arg3[%c0_37, %c0_38, %c0_39] : memref<1x8x32xf32, #tpu.memory_space<vmem>>, vector<1x8x32xf32>
      %48 = vector.shape_cast %47 : vector<1x8x32xf32> to vector<8x32xf32>
      %c0_40 = arith.constant 0 : index
      %c0_41 = arith.constant 0 : index
      %c0_42 = arith.constant 0 : index
      %49 = vector.load %arg13[%c0_40, %c0_41, %c0_42] : memref<4x8x8xf32, #tpu.memory_space<vmem>>, vector<4x8x8xf32>
      %c0_43 = arith.constant 0 : index
      %c0_44 = arith.constant 0 : index
      %c0_45 = arith.constant 0 : index
      %50 = vector.load %arg12[%c0_43, %c0_44, %c0_45] : memref<4x8x1xf32, #tpu.memory_space<vmem>>, vector<4x8x1xf32>
      %cst_46 = arith.constant 1.000000e+00 : f32
      %51 = vector.broadcast %cst_46 : f32 to vector<4x8x1xf32>
      %52 = arith.divf %51, %50 : vector<4x8x1xf32>
      %53 = vector.broadcast %52 : vector<4x8x1xf32> to vector<4x8x8xf32>
      %54 = arith.mulf %49, %53 : vector<4x8x8xf32>
      %55 = tpu.transpose %54, [1, 0, 2] : vector<4x8x8xf32> -> vector<8x4x8xf32>
      %56 = vector.shape_cast %55 : vector<8x4x8xf32> to vector<8x32xf32>
      %c0_47 = arith.constant 0 : index
      %c0_48 = arith.constant 0 : index
      %57 = vector.load %arg7[%c0_47, %c0_48] : memref<32x32xf32, #tpu.memory_space<vmem>>, vector<32x32xf32>
      %cst_49 = arith.constant dense<0.000000e+00> : vector<8x32xf32>
      %58 = tpu.matmul %56, %57, %cst_49 {dimension_numbers = #tpu.dot_dimension_numbers<[1], [0], [0], [1], [0, 0, 1, 1], [], []>} : vector<8x32xf32>, vector<32x32xf32>, vector<8x32xf32> -> vector<8x32xf32>
      %59 = arith.addf %48, %58 : vector<8x32xf32>
      %60 = arith.mulf %59, %59 : vector<8x32xf32>
      %cst_50 = arith.constant dense<0.000000e+00> : vector<8xf32>
      %61 = vector.multi_reduction <add>, %60, %cst_50 [1] : vector<8x32xf32> to vector<8xf32>
      %62 = vector.shape_cast %61 : vector<8xf32> to vector<8x1xf32>
      %cst_51 = arith.constant 3.200000e+01 : f32
      %63 = vector.broadcast %cst_51 : f32 to vector<8x1xf32>
      %64 = arith.divf %62, %63 : vector<8x1xf32>
      %cst_52 = arith.constant 9.99999997E-7 : f32
      %65 = vector.broadcast %cst_52 : f32 to vector<8x1xf32>
      %66 = arith.addf %64, %65 : vector<8x1xf32>
      %67 = math.rsqrt %66 : vector<8x1xf32>
      %68 = vector.broadcast %67 : vector<8x1xf32> to vector<8x32xf32>
      %69 = arith.mulf %59, %68 : vector<8x32xf32>
      %c0_53 = arith.constant 0 : index
      %c0_54 = arith.constant 0 : index
      %70 = vector.load %arg8[%c0_53, %c0_54] : memref<32x128xf32, #tpu.memory_space<vmem>>, vector<32x128xf32>
      %cst_55 = arith.constant dense<0.000000e+00> : vector<8x128xf32>
      %71 = tpu.matmul %69, %70, %cst_55 {dimension_numbers = #tpu.dot_dimension_numbers<[1], [0], [0], [1], [0, 0, 1, 1], [], []>} : vector<8x32xf32>, vector<32x128xf32>, vector<8x128xf32> -> vector<8x128xf32>
      %72 = vector.extract_strided_slice %71 {offsets = [0, 0], sizes = [8, 64], strides = [1, 1]} : vector<8x128xf32> to vector<8x64xf32>
      %73 = vector.extract_strided_slice %71 {offsets = [0, 64], sizes = [8, 64], strides = [1, 1]} : vector<8x128xf32> to vector<8x64xf32>
      %74 = arith.negf %73 : vector<8x64xf32>
      %75 = math.exp %74 : vector<8x64xf32>
      %cst_56 = arith.constant 1.000000e+00 : f32
      %76 = vector.broadcast %cst_56 : f32 to vector<8x64xf32>
      %77 = arith.addf %76, %75 : vector<8x64xf32>
      %78 = arith.divf %76, %77 : vector<8x64xf32>
      %79 = arith.mulf %73, %78 : vector<8x64xf32>
      %80 = arith.mulf %72, %79 : vector<8x64xf32>
      %c0_57 = arith.constant 0 : index
      %c0_58 = arith.constant 0 : index
      %81 = vector.load %arg9[%c0_57, %c0_58] : memref<64x32xf32, #tpu.memory_space<vmem>>, vector<64x32xf32>
      %cst_59 = arith.constant dense<0.000000e+00> : vector<8x32xf32>
      %82 = tpu.matmul %80, %81, %cst_59 {dimension_numbers = #tpu.dot_dimension_numbers<[1], [0], [0], [1], [0, 0, 1, 1], [], []>} : vector<8x64xf32>, vector<64x32xf32>, vector<8x32xf32> -> vector<8x32xf32>
      %83 = arith.addf %59, %82 : vector<8x32xf32>
      %c0_60 = arith.constant 0 : index
      %c0_61 = arith.constant 0 : index
      %c0_62 = arith.constant 0 : index
      %84 = vector.load %arg10[%c0_60, %c0_61, %c0_62] : memref<1x8x32xf32, #tpu.memory_space<vmem>>, vector<1x8x32xf32>
      %85 = vector.shape_cast %84 : vector<1x8x32xf32> to vector<8x32xf32>
      %86 = vector.shape_cast %83 : vector<8x32xf32> to vector<1x8x32xf32>
      tpu.vector_store %arg10[%c0_60, %c0_61, %c0_62], %86 {strides = array<i32>} : memref<1x8x32xf32, #tpu.memory_space<vmem>>, vector<1x8x32xf32>,
    } else {
    }
    return
  }
  func.func @transform_0(%arg0: i32, %arg1: i32, %arg2: i32) -> (i32, i32, i32) {
    %c0_i32 = arith.constant 0 : i32
    %c0_i32_0 = arith.constant 0 : i32
    return %arg0, %arg1, %c0_i32 : i32, i32, i32
  }
  func.func @transform_1(%arg0: i32, %arg1: i32, %arg2: i32) -> (i32, i32, i32, i32) {
    %c0_i32 = arith.constant 0 : i32
    %c0_i32_0 = arith.constant 0 : i32
    %c0_i32_1 = arith.constant 0 : i32
    return %arg0, %c0_i32, %arg1, %c0_i32_0 : i32, i32, i32, i32
  }
  func.func @transform_2(%arg0: i32, %arg1: i32, %arg2: i32) -> (i32, i32, i32, i32) {
    %c0_i32 = arith.constant 0 : i32
    %c0_i32_0 = arith.constant 0 : i32
    %c0_i32_1 = arith.constant 0 : i32
    return %arg0, %c0_i32, %arg2, %c0_i32_0 : i32, i32, i32, i32
  }
  func.func @transform_3(%arg0: i32, %arg1: i32, %arg2: i32) -> (i32, i32, i32, i32) {
    %c0_i32 = arith.constant 0 : i32
    %c0_i32_0 = arith.constant 0 : i32
    %c0_i32_1 = arith.constant 0 : i32
    return %arg0, %c0_i32, %arg2, %c0_i32_0 : i32, i32, i32, i32
  }
  func.func @transform_4(%arg0: i32, %arg1: i32, %arg2: i32) -> (i32, i32) {
    %c0_i32 = arith.constant 0 : i32
    %c0_i32_0 = arith.constant 0 : i32
    %c0_i32_1 = arith.constant 0 : i32
    return %c0_i32, %c0_i32_0 : i32, i32
  }
  func.func @transform_5(%arg0: i32, %arg1: i32, %arg2: i32) -> (i32, i32) {
    %c0_i32 = arith.constant 0 : i32
    %c0_i32_0 = arith.constant 0 : i32
    %c0_i32_1 = arith.constant 0 : i32
    return %c0_i32, %c0_i32_0 : i32, i32
  }
  func.func @transform_6(%arg0: i32, %arg1: i32, %arg2: i32) -> (i32, i32) {
    %c0_i32 = arith.constant 0 : i32
    %c0_i32_0 = arith.constant 0 : i32
    %c0_i32_1 = arith.constant 0 : i32
    return %c0_i32, %c0_i32_0 : i32, i32
  }
  func.func @transform_7(%arg0: i32, %arg1: i32, %arg2: i32) -> (i32, i32, i32) {
    %c0_i32 = arith.constant 0 : i32
    %c0_i32_0 = arith.constant 0 : i32
    return %arg0, %arg1, %c0_i32 : i32, i32, i32
  }
}

</mosaic_0001>

<bundles_post_ra>
// kernel: block_forward.2
= control target key start
LH: loop header
LB: loop body
LE: loop exit
PB: predicated region body
PF: predicated region fallthrough
CT: control target
= control target key end

     0   :  { %s1403_s21 = smov 0   ;;  %s1405_s22 = smov 0   ;;  %s1634_s0 = inlined_call_operand.vmem [shape: f32[2,8,32], index: 0, kind: input, shape index: {}]   ;;  %s1635_s1 = inlined_call_operand.vmem [shape: f32[2,8,8], index: 1, kind: input, shape index: {}]   ;;  %s1636_s2 = inlined_call_operand.vmem [shape: f32[2,8,8], index: 2, kind: input, shape index: {}]   ;;  %s1637_s3 = inlined_call_operand.vmem [shape: f32[32,96], index: 3, kind: input, shape index: {}]   ;;  %s1638_s4 = inlined_call_operand.vmem [shape: f32[2,4,8,8], index: 4, kind: output, shape index: {0}]   ;;  %s1639_s5 = inlined_call_operand.vmem [shape: f32[2,4,8,8], index: 5, kind: output, shape index: {1}]   ;;  %s1640_s6 = inlined_call_operand.vmem [shape: f32[2,4,8,8], index: 6, kind: output, shape index: {2}]  }
   0x1   :  { %s1407_s23 = smov 0  }
   0x2 LB: > { %s29_s24 = sadd.s32 1, %s1350_s22  ;;  %p1250_p0 = scmp.ge.s32.totalorder %s1354_s23, 1  ;;  %s1354_s23 = sphi %s1407_s23, %s17_s23   ;;  %s1350_s22 = sphi %s1405_s22, %s1642_s22   ;;  %s1346_s21 = sphi %s1403_s21, %s1641_s21  }
   0x3   : > { %p31_p1 = scmp.ge.s32.totalorder %s29_s24, 2  ;;  %p267_p2 = scmp.lt.s32.totalorder %s1354_s23, 3 }
   0x5   : > { %s1644_s24 = smov (%p31_p1, %s29_s24), 0  ;;  %p268_p3 = pnand %p1250_p0, %p267_p2 }
   0x6   : > { %p332_p4 = scmp.lt.s32.totalorder (!%p268_p3), %s1346_s21, 1  ;;  %vm379_vm0 = vcmask (!%p268_p3), 261120   ;;  %v388_v3 = vld [vmem:[%s1637_s3] sm:$0xff] (!%p268_p3)  ;;  %v389_v4 = vld [vmem:[%s1637_s3 + $0x8] sm:$0xff] (!%p268_p3)  ;;  %v390_v5 = vld [vmem:[%s1637_s3 + $0x10] sm:$0xff] (!%p268_p3)  ;;  %v1356_v6 = vmov (!%p268_p3), 0.0|0.0   ;;  %v482_v21 = vlaneseq (!%p268_p3) }
   0x7   : > { %271 = sbr.rel (%p268_p3) target bundleno = 784 (0x310), region = 36  ;;  %1288 = vmatprep.subr.bf16.mxu0 (!%p268_p3), %v1356_v6  ;;  %v1289_v7 = vpack.c.bf16 (!%p268_p3), %v389_v4, %v388_v3  ;;  %v391_v8 = vld [vmem:[%s1637_s3 + $0x18] sm:$0xff] (!%p268_p3)  ;;  %vm1357_vm1 = vmmov (!%p268_p3), 0   ;;  %v1358_v9 = vmov (!%p268_p3), 0.0   ;;  %s1359_s16 = smov (!%p268_p3), 112   ;;  %vm677_vm2 = vcmask (!%p268_p3), 64512  }
   0x8   : > { %1285 = vmatprep.mubr.msk.f32.mxu0 (!%p268_p3), %vm1357_vm1, %v1358_v9  ;;  %v1292_v10 = vpack.c.bf16 (!%p268_p3), %v391_v8, %v390_v5  ;;  %s1360_s17 = smov (!%p268_p3), 120   ;;  %s1361_s18 = smov (!%p268_p3), 104   ;;  %v1364_v19 = vmov (!%p268_p3), 1983009808   ;;  %v1365_v22 = vmov (!%p268_p3), 1934713408  }
   0x9   : > { %1290 = vmatpush3.bf16.msra.mxu0 (!%p268_p3), %v1289_v7  ;;  %s1362_s19 = smov (!%p268_p3), 124   ;;  %s1363_s20 = smov (!%p268_p3), 96   ;;  %v480_v20 = vunpack.c.l.s4 (!%p268_p3), %v1364_v19  ;;  %v512_v23 = vunpack.c.l.s4 (!%p268_p3), %v1365_v22  ;;  %v483_v25 = vshrl.u32 (!%p268_p3), %v482_v21, 7  ;;  %vm672_vm3 = vcmask (!%p268_p3), 31744  }
   0xa   : > { %1291 = vmatprep.subr.bf16.mxu0 (!%p268_p3), %v1356_v6  ;;  %s1366_s26 = smov (!%p268_p3), 64   ;;  %s1367_s27 = smov (!%p268_p3), 4  }
   0xb   : > { %v481_v24 = vunpack.c.0.s8 (!%p268_p3), %v480_v20  ;;  %v513_v30 = vunpack.c.0.s8 (!%p268_p3), %v512_v23 }
   0xd   : > { %1293 = vmatpush3.bf16.msra.mxu0 (!%p268_p3), %v1292_v10  ;;  %v1452_v31 = vsub.s32 (!%p268_p3), %v481_v24, %v483_v25  ;;  %v1456_v35 = vsub.s32 (!%p268_p3), %v513_v30, %v483_v25 }
   0xe   : > { %s1646_s21 = smov (!%p332_p4, %s1346_s21), 1 }
   0xf   : > { %s1424_s25 = sshll.u32 %s1646_s21, 3 }
  0x10   : > { %s338_s28 = scalar_lea.vmem %s1634_s0, %s1424_s25  ;;  %s352_s15 = scalar_lea.vmem %s1636_s2, %s1424_s25 }
  0x11   : > { %v377_v0 = vld [vmem:[%s338_s28] sm:$0xff]  ;;  %s1557_s28 = sshll.u32 %s1646_s21, 5  ;;  %s345_s9 = scalar_lea.vmem %s1635_s1, %s1424_s25 }
  0x12   : > { %v378_v1 = vmul.f32 %v377_v0, %v377_v0  ;;  %v466_v18 = vld [vmem:[%s352_s15] sm:$0xff]  ;;  %s376_s30 = scalar_lea.vmem %s1640_s6, %s1557_s28  ;;  %s360_s12 = scalar_lea.vmem %s1638_s4, %s1557_s28 }
  0x13   : > { %s368_s14 = scalar_lea.vmem %s1639_s5, %s1557_s28 }
  0x14   : > { %v380_v2 = vsel %vm379_vm0, %v378_v1, 0.0 }
  0x15   : > { %381 = vadd.xlane.f32.xlu0 %v380_v2 }
  0xa2   : > { %v382_v11 = vpop.xlane.xlu0 %381 }
  0xa3   : > { %v384_v12 = vmul.f32 0.03125, %v382_v11 }
  0xa5   : > { %v385_v13 = vadd.f32 1e-06, %v384_v12 }
  0xa7   : > { %1330 = vrsqrt.f32 %v385_v13 }
  0xb1   : > { %v1331_v14 = vpop.eup %1330 }
  0xb2   : > { %v387_v15 = vmul.f32 %v1331_v14, %v377_v0 }
  0xb4   : > { %1286 = vmatmul.mubr.msk.f32.vlgmr.msra.gmra.mrb[0].mxu0 %vm379_vm0, %v387_v15 }
 0x187   : > { %v461_v16 = vpop.f32.mrb[0].mxu0 }
 0x188   : > { %471 = vrot.lane.b32.xlu1 %v461_v16, %s1359_s16  ;;  %468 = vrot.lane.b32.xlu0 %v461_v16, %s1360_s17  ;;  %v1287_v17 = vpop.f32.mrb[1].mxu0 }
 0x18c   : > { %474 = vrot.lane.b32.xlu1 %v461_v16, %s1361_s18  ;;  %645 = vrot.lane.b32.xlu0 %v466_v18, %s1362_s19 }
 0x190   : > { %682 = vrot.lane.b32.xlu1 %v461_v16, %s1363_s20 }
 0x1fa   : > { %v472_v26 = vpop.permute.xlu1 %471  ;;  %v469_v27 = vpop.permute.xlu0 %468 }
 0x1fb   : > { %v477_v28 = vcombine.low %v461_v16, %v472_v26  ;;  %v478_v29 = vcombine.high %v461_v16, %v472_v26  ;;  %892 = vrot.lane.b32.xlu0 %v469_v27, %s1366_s26  ;;  %684 = vrot.lane.b32.xlu1 %v469_v27, %s1363_s20 }
 0x1fd   : > { %v485_v36 = vrot.slane %v477_v28, %v1452_v31  ;;  %v492_v37 = vrot.slane %v478_v29, %v1452_v31 }
 0x1fe   : > { %v475_v32 = vpop.permute.xlu1 %474  ;;  %v1486_v7 = vpop.permute.xlu0 %645 }
 0x1ff   : > { %v493_v33 = vcombine.low %v469_v27, %v475_v32  ;;  %v494_v34 = vcombine.high %v469_v27, %v475_v32  ;;  %896 = vrot.lane.b32.xlu0 %v475_v32, %s1366_s26  ;;  %686 = vrot.lane.b32.xlu1 %v472_v26, %s1363_s20 }
 0x201   : > { %v501_v38 = vrot.slane %v493_v33, %v1452_v31  ;;  %v508_v39 = vrot.slane %v494_v34, %v1452_v31 }
 0x202   : > { %v683_v4 = vpop.permute.xlu1 %682 }
 0x203   : > { %v509_v40 = vcombine.low %v485_v36, %v501_v38  ;;  %v510_v41 = vcombine.high %v485_v36, %v501_v38  ;;  %v525_v42 = vcombine.low %v492_v37, %v508_v39  ;;  %v526_v43 = vcombine.high %v492_v37, %v508_v39  ;;  %688 = vrot.lane.b32.xlu1 %v475_v32, %s1363_s20 }
 0x205   : > { %v517_v44 = vrot.slane %v509_v40, %v1456_v35  ;;  %v524_v45 = vrot.slane %v510_v41, %v1456_v35  ;;  %v533_v46 = vrot.slane %v525_v42, %v1456_v35  ;;  %v540_v47 = vrot.slane %v526_v43, %v1456_v35 }
 0x207   : > { %v545_v48 = vcombine.low %v517_v44, %v524_v45  ;;  %v1261_v49 = vcombine.high %v517_v44, %v524_v45  ;;  %v561_v50 = vcombine.low %v533_v46, %v540_v47  ;;  %v1262_v51 = vcombine.high %v533_v46, %v540_v47  ;;  %618 = vrot.lane.b32.xlu1 %v466_v18, %s1367_s27 }
 0x209   : > { %v552_v52 = vrot.slane %v545_v48, %v1452_v31  ;;  %v560_v53 = vrot.slane %v1261_v49, %v1452_v31  ;;  %v568_v54 = vrot.slane %v561_v50, %v1452_v31  ;;  %v576_v55 = vrot.slane %v1262_v51, %v1452_v31 }
 0x20b   : > { %890 = vrot.lane.b32.xlu1 %v461_v16, %s1366_s26  ;;  %v577_v56 = vcombine.low %v552_v52, %v560_v53  ;;  %v593_v57 = vcombine.low %v568_v54, %v576_v55  ;;  %v578_v58 = vcombine.high %v552_v52, %v560_v53  ;;  %v594_v59 = vcombine.high %v568_v54, %v576_v55 }
 0x20d   : > { %v585_v60 = vrot.slane %v577_v56, %v1456_v35  ;;  %v601_v61 = vrot.slane %v593_v57, %v1456_v35  ;;  %v592_v62 = vrot.slane %v578_v58, %v1456_v35  ;;  %v608_v63 = vrot.slane %v594_v59, %v1456_v35 }
 0x20f   : > { %894 = vrot.lane.b32.xlu1 %v472_v26, %s1366_s26  ;;  %v1478_v0 = vcombine.high %v585_v60, %v601_v61  ;;  %v1480_v1 = vcombine.low %v585_v60, %v601_v61  ;;  %v1482_v2 = vcombine.high %v592_v62, %v608_v63  ;;  %v1484_v3 = vcombine.low %v592_v62, %v608_v63 }
 0x211   : > { %v649_v46 = vmul.f32 %v1486_v7, %v1478_v0  ;;  %v648_v47 = vmul.f32 %v1486_v7, %v1480_v1  ;;  %v651_v60 = vmul.f32 %v1486_v7, %v1482_v2  ;;  %v650_v61 = vmul.f32 %v1486_v7, %v1484_v3 }
 0x26d   : > { %v685_v5 = vpop.permute.xlu1 %684  ;;  %v893_v11 = vpop.permute.xlu0 %892 }
 0x271   : > { %v687_v6 = vpop.permute.xlu1 %686  ;;  %v897_v25 = vpop.permute.xlu0 %896 }
 0x272   : > { %v694_v8 = vcombine.low %v683_v4, %v687_v6  ;;  %v695_v9 = vcombine.high %v683_v4, %v687_v6  ;;  %v918_v37 = vcombine.low %v893_v11, %v897_v25  ;;  %v919_v38 = vcombine.high %v893_v11, %v897_v25 }
 0x274   : > { %v702_v14 = vrot.slane %v694_v8, %v1452_v31  ;;  %v709_v15 = vrot.slane %v695_v9, %v1452_v31  ;;  %v926_v52 = vrot.slane %v918_v37, %v1452_v31  ;;  %v933_v53 = vrot.slane %v919_v38, %v1452_v31 }
 0x275   : > { %v689_v10 = vpop.permute.xlu1 %688 }
 0x276   : > { %v710_v12 = vcombine.low %v685_v5, %v689_v10  ;;  %v711_v13 = vcombine.high %v685_v5, %v689_v10 }
 0x278   : > { %v718_v16 = vrot.slane %v710_v12, %v1452_v31  ;;  %v725_v17 = vrot.slane %v711_v13, %v1452_v31 }
 0x279   : > { %v1492_v18 = vpop.permute.xlu1 %618 }
 0x27a   : > { %v726_v19 = vcombine.low %v702_v14, %v718_v16  ;;  %v727_v20 = vcombine.high %v702_v14, %v718_v16  ;;  %v742_v21 = vcombine.low %v709_v15, %v725_v17  ;;  %v743_v22 = vcombine.high %v709_v15, %v725_v17 }
 0x27b   : > { %v622_v23 = vmul.f32 %v1492_v18, %v1478_v0  ;;  %v621_v24 = vmul.f32 %v1492_v18, %v1480_v1  ;;  %v624_v39 = vmul.f32 %v1492_v18, %v1482_v2  ;;  %v623_v40 = vmul.f32 %v1492_v18, %v1484_v3 }
 0x27c   : > { %v734_v26 = vrot.slane %v726_v19, %v1456_v35  ;;  %v741_v27 = vrot.slane %v727_v20, %v1456_v35  ;;  %v750_v28 = vrot.slane %v742_v21, %v1456_v35  ;;  %v757_v29 = vrot.slane %v743_v22, %v1456_v35 }
 0x27d   : > { %631 = vrot.lane.b32.xlu0 %v622_v23, %s1362_s19  ;;  %629 = vrot.lane.b32.xlu1 %v621_v24, %s1362_s19  ;;  %v891_v30 = vpop.permute.xlu1 %890 }
 0x27e   : > { %v762_v32 = vcombine.low %v734_v26, %v741_v27  ;;  %v1263_v33 = vcombine.high %v734_v26, %v741_v27  ;;  %v778_v34 = vcombine.low %v750_v28, %v757_v29  ;;  %v1264_v36 = vcombine.high %v750_v28, %v757_v29 }
 0x280   : > { %v769_v41 = vrot.slane %v762_v32, %v1452_v31  ;;  %v777_v42 = vrot.slane %v1263_v33, %v1452_v31  ;;  %v785_v43 = vrot.slane %v778_v34, %v1452_v31  ;;  %v793_v44 = vrot.slane %v1264_v36, %v1452_v31 }
 0x281   : > { %635 = vrot.lane.b32.xlu0 %v624_v39, %s1362_s19  ;;  %633 = vrot.lane.b32.xlu1 %v623_v40, %s1362_s19  ;;  %v895_v45 = vpop.permute.xlu1 %894 }
 0x282   : > { %v902_v48 = vcombine.low %v891_v30, %v895_v45  ;;  %v903_v49 = vcombine.high %v891_v30, %v895_v45  ;;  %v794_v50 = vcombine.low %v769_v41, %v777_v42  ;;  %v810_v51 = vcombine.low %v785_v43, %v793_v44 }
 0x283   : > { %v795_v54 = vcombine.high %v769_v41, %v777_v42  ;;  %v811_v55 = vcombine.high %v785_v43, %v793_v44 }
 0x284   : > { %v910_v56 = vrot.slane %v902_v48, %v1452_v31  ;;  %v917_v57 = vrot.slane %v903_v49, %v1452_v31  ;;  %v802_v58 = vrot.slane %v794_v50, %v1456_v35  ;;  %v818_v59 = vrot.slane %v810_v51, %v1456_v35 }
 0x285   : > { %658 = vrot.lane.b32.xlu0 %v649_v46, %s1367_s27  ;;  %656 = vrot.lane.b32.xlu1 %v648_v47, %s1367_s27  ;;  %v809_v9 = vrot.slane %v795_v54, %v1456_v35  ;;  %v825_v10 = vrot.slane %v811_v55, %v1456_v35  ;;  %v465_v47 = vld [vmem:[%s345_s9] sm:$0xff] }
 0x286   : > { %v934_v62 = vcombine.low %v910_v56, %v926_v52  ;;  %v935_v63 = vcombine.high %v910_v56, %v926_v52  ;;  %v950_v4 = vcombine.low %v917_v57, %v933_v53  ;;  %v951_v5 = vcombine.high %v917_v57, %v933_v53 }
 0x287   : > { %v1530_v6 = vcombine.high %v802_v58, %v818_v59  ;;  %v1532_v8 = vcombine.low %v802_v58, %v818_v59  ;;  %v1546_v22 = vcombine.high %v809_v9, %v825_v10  ;;  %v1548_v23 = vcombine.low %v809_v9, %v825_v10 }
 0x288   : > { %v942_v11 = vrot.slane %v934_v62, %v1456_v35  ;;  %v949_v12 = vrot.slane %v935_v63, %v1456_v35  ;;  %v958_v13 = vrot.slane %v950_v4, %v1456_v35  ;;  %v965_v14 = vrot.slane %v951_v5, %v1456_v35 }
 0x289   : > { %662 = vrot.lane.b32.xlu0 %v651_v60, %s1367_s27  ;;  %660 = vrot.lane.b32.xlu1 %v650_v61, %s1367_s27  ;;  %v835_v20 = vmul.f32 %v1530_v6, %v1492_v18  ;;  %v834_v21 = vmul.f32 %v1532_v8, %v1492_v18  ;;  %v837_v33 = vmul.f32 %v1546_v22, %v1492_v18 }
 0x28a   : > { %v970_v15 = vcombine.low %v942_v11, %v949_v12  ;;  %v1265_v16 = vcombine.high %v942_v11, %v949_v12  ;;  %v986_v17 = vcombine.low %v958_v13, %v965_v14  ;;  %v1266_v19 = vcombine.high %v958_v13, %v965_v14 }
 0x28b   : > { %v836_v34 = vmul.f32 %v1548_v23, %v1492_v18  ;;  %v859_v42 = vmul.f32 %v1530_v6, %v1486_v7  ;;  %v861_v43 = vmul.f32 %v1546_v22, %v1486_v7  ;;  %v860_v44 = vmul.f32 %v1548_v23, %v1486_v7 }
 0x28c   : > { %v977_v24 = vrot.slane %v970_v15, %v1452_v31  ;;  %v985_v25 = vrot.slane %v1265_v16, %v1452_v31  ;;  %v993_v26 = vrot.slane %v986_v17, %v1452_v31  ;;  %v1001_v27 = vrot.slane %v1266_v19, %v1452_v31 }
 0x28d   : > { %844 = vrot.lane.b32.xlu0 %v835_v20, %s1362_s19  ;;  %842 = vrot.lane.b32.xlu1 %v834_v21, %s1362_s19  ;;  %v614_v50 = vmul.f32 %v1478_v0, %v465_v47  ;;  %v613_v51 = vmul.f32 %v1480_v1, %v465_v47  ;;  %v616_v57 = vmul.f32 %v1482_v2, %v465_v47 }
 0x28e   : > { %v1002_v28 = vcombine.low %v977_v24, %v985_v25  ;;  %v1003_v29 = vcombine.high %v977_v24, %v985_v25  ;;  %v1018_v30 = vcombine.low %v993_v26, %v1001_v27  ;;  %v1019_v32 = vcombine.high %v993_v26, %v1001_v27 }
 0x28f   : > { %v615_v58 = vmul.f32 %v1484_v3, %v465_v47  ;;  %v831_v12 = vmul.f32 %v1530_v6, %v465_v47  ;;  %v830_v13 = vmul.f32 %v1532_v8, %v465_v47  ;;  %v833_v21 = vmul.f32 %v1546_v22, %v465_v47 }
 0x290   : > { %v1010_v36 = vrot.slane %v1002_v28, %v1456_v35  ;;  %v1017_v31 = vrot.slane %v1003_v29, %v1456_v35  ;;  %v1026_v37 = vrot.slane %v1018_v30, %v1456_v35  ;;  %v1033_v38 = vrot.slane %v1019_v32, %v1456_v35 }
 0x291   : > { %848 = vrot.lane.b32.xlu0 %v837_v33, %s1362_s19  ;;  %846 = vrot.lane.b32.xlu1 %v836_v34, %s1362_s19  ;;  %v858_v35 = vmul.f32 %v1532_v8, %v1486_v7  ;;  %v832_v24 = vmul.f32 %v1548_v23, %v465_v47 }
 0x292   : > { %v1034_v39 = vcombine.low %v1010_v36, %v1026_v37  ;;  %v1035_v40 = vcombine.high %v1010_v36, %v1026_v37  ;;  %v1036_v18 = vcombine.low %v1017_v31, %v1033_v38  ;;  %v1037_v41 = vcombine.high %v1017_v31, %v1033_v38 }
 0x294   : > { %1038 = vst.msk [vmem:[%s376_s30] sm:$0xff] %vm677_vm2, %v1034_v39  ;;  %1039 = vst.msk [vmem:[%s376_s30 + $0x8] sm:$0xff] %vm677_vm2, %v1035_v40 }
 0x295   : > { %1040 = vst.msk [vmem:[%s376_s30 + $0x10] sm:$0xff] %vm677_vm2, %v1036_v18  ;;  %1041 = vst.msk [vmem:[%s376_s30 + $0x18] sm:$0xff] %vm677_vm2, %v1037_v41  ;;  %868 = vrot.lane.b32.xlu0 %v859_v42, %s1367_s27  ;;  %866 = vrot.lane.b32.xlu1 %v858_v35, %s1367_s27 }
 0x299   : > { %872 = vrot.lane.b32.xlu0 %v861_v43, %s1367_s27  ;;  %870 = vrot.lane.b32.xlu1 %v860_v44, %s1367_s27 }
 0x2ef   : > { %v632_v45 = vpop.permute.xlu0 %631  ;;  %v630_v46 = vpop.permute.xlu1 %629 }
 0x2f0   : > { %v642_v53 = vadd.f32 %v632_v45, %v614_v50  ;;  %v641_v54 = vadd.f32 %v630_v46, %v613_v51 }
 0x2f3   : > { %v636_v48 = vpop.permute.xlu0 %635  ;;  %v634_v49 = vpop.permute.xlu1 %633 }
 0x2f4   : > { %v644_v61 = vadd.f32 %v636_v48, %v616_v57  ;;  %v643_v62 = vadd.f32 %v634_v49, %v615_v58 }
 0x2f7   : > { %v659_v7 = vpop.permute.xlu0 %658  ;;  %v657_v52 = vpop.permute.xlu1 %656 }
 0x2f8   : > { %v669_v55 = vadd.f32 %v659_v7, %v614_v50  ;;  %v668_v56 = vadd.f32 %v657_v52, %v613_v51 }
 0x2fa   : > { %v674_v59 = vsel %vm672_vm3, %v642_v53, %v669_v55  ;;  %v673_v0 = vsel %vm672_vm3, %v641_v54, %v668_v56 }
 0x2fb   : > { %679 = vst.msk [vmem:[%s360_s12 + $0x8] sm:$0xff] %vm677_vm2, %v674_v59  ;;  %678 = vst.msk [vmem:[%s360_s12] sm:$0xff] %vm677_vm2, %v673_v0  ;;  %v663_v1 = vpop.permute.xlu0 %662  ;;  %v661_v60 = vpop.permute.xlu1 %660 }
 0x2fc   : > { %v671_v63 = vadd.f32 %v663_v1, %v616_v57  ;;  %v670_v4 = vadd.f32 %v661_v60, %v615_v58 }
 0x2fe   : > { %v676_v5 = vsel %vm672_vm3, %v644_v61, %v671_v63  ;;  %v675_v2 = vsel %vm672_vm3, %v643_v62, %v670_v4 }
 0x2ff   : > { %681 = vst.msk [vmem:[%s360_s12 + $0x18] sm:$0xff] %vm677_vm2, %v676_v5  ;;  %680 = vst.msk [vmem:[%s360_s12 + $0x10] sm:$0xff] %vm677_vm2, %v675_v2  ;;  %v845_v3 = vpop.permute.xlu0 %844  ;;  %v843_v9 = vpop.permute.xlu1 %842 }
 0x300   : > { %v855_v16 = vadd.f32 %v845_v3, %v831_v12  ;;  %v854_v17 = vadd.f32 %v843_v9, %v830_v13 }
 0x303   : > { %v849_v10 = vpop.permute.xlu0 %848  ;;  %v847_v11 = vpop.permute.xlu1 %846 }
 0x304   : > { %v857_v27 = vadd.f32 %v849_v10, %v833_v21  ;;  %v856_v28 = vadd.f32 %v847_v11, %v832_v24 }
 0x307   : > { %v869_v14 = vpop.permute.xlu0 %868  ;;  %v867_v15 = vpop.permute.xlu1 %866 }
 0x308   : > { %v879_v19 = vadd.f32 %v869_v14, %v831_v12  ;;  %v878_v20 = vadd.f32 %v867_v15, %v830_v13 }
 0x30a   : > { %v883_v25 = vsel %vm672_vm3, %v855_v16, %v879_v19  ;;  %v882_v6 = vsel %vm672_vm3, %v854_v17, %v878_v20 }
 0x30b   : > { %887 = vst.msk [vmem:[%s368_s14 + $0x8] sm:$0xff] %vm677_vm2, %v883_v25  ;;  %886 = vst.msk [vmem:[%s368_s14] sm:$0xff] %vm677_vm2, %v882_v6  ;;  %v873_v8 = vpop.permute.xlu0 %872  ;;  %v871_v26 = vpop.permute.xlu1 %870 }
 0x30c   : > { %v881_v29 = vadd.f32 %v873_v8, %v833_v21  ;;  %v880_v30 = vadd.f32 %v871_v26, %v832_v24 }
 0x30e   : > { %v885_v32 = vsel %vm672_vm3, %v857_v27, %v881_v29  ;;  %v884_v22 = vsel %vm672_vm3, %v856_v28, %v880_v30 }
 0x30f   : > { %889 = vst.msk [vmem:[%s368_s14 + $0x18] sm:$0xff] %vm677_vm2, %v885_v32  ;;  %888 = vst.msk [vmem:[%s368_s14 + $0x10] sm:$0xff] %vm677_vm2, %v884_v22 }
 0x310 PF: > { %s17_s23 = sadd.s32 1, %s1354_s23   ;;  %s1641_s21 = smov %s1350_s22 }
 0x311   : > { %p14_p5 = scmp.ge.s32.totalorder %s17_s23, 4   ;;  %s1642_s22 = smov %s1644_s24 }
 0x313   :  { %16 = sbr.rel (!%p14_p5) target bundleno = 2 (0x2), region = 96 }

// kernel: block_forward.3
= control target key start
LH: loop header
LB: loop body
LE: loop exit
PB: predicated region body
PF: predicated region fallthrough
CT: control target
= control target key end

     0   :  { %12 = vsyncpa [#allocation6], 0  ;;  %s3242_s0 = inlined_call_operand.vmem [shape: f32[2,8,32], index: 0, kind: input, shape index: {}]   ;;  %s3243_s1 = inlined_call_operand.vmem [shape: f32[2,4,8,8], index: 1, kind: input, shape index: {}]   ;;  %s3244_s2 = inlined_call_operand.vmem [shape: f32[2,4,8,8], index: 2, kind: input, shape index: {}]   ;;  %s3245_s3 = inlined_call_operand.vmem [shape: f32[2,4,8,8], index: 3, kind: input, shape index: {}]   ;;  %s3246_s4 = inlined_call_operand.vmem [shape: f32[32,32], index: 4, kind: input, shape index: {}]   ;;  %s3247_s5 = inlined_call_operand.vmem [shape: f32[32,128], index: 5, kind: input, shape index: {}]   ;;  %s3248_s6 = inlined_call_operand.vmem [shape: f32[64,32], index: 6, kind: input, shape index: {}]   ;;  %s3249_s7 = inlined_call_operand.hbm [shape: f32[2,8,32], index: 7, kind: output, shape index: {}]  }
   0x1   :  { %14 = vsyncpa [#allocation6 + $0x1], 0  ;;  %s2935_s24 = smov 0   ;;  %s2937_s25 = smov 0  }
   0x2   :  { %s2939_s26 = smov 0   ;;  %s2941_s27 = smov 0  }
   0x3   :  { %s2943_s28 = smov 0   ;;  %s2945_s29 = smov 0  }
   0x4 LB: > { %s2513_s30 = sadd.s32 4294967295, %s2880_s29   ;;  %s2514_s8 = sadd.s32 4294967294, %s2880_s29   ;;  %s2880_s29 = sphi %s2945_s29, %s20_s29   ;;  %s2876_s28 = sphi %s2943_s28, %s3256_s28   ;;  %s2872_s27 = sphi %s2941_s27, %s3255_s27   ;;  %s2868_s26 = sphi %s2939_s26, %s3254_s26   ;;  %s2864_s25 = sphi %s2937_s25, %s3253_s25   ;;  %s2860_s24 = sphi %s2935_s24, %s3252_s24  }
   0x5   : > { %s39_s9 = sadd.s32 1, %s2876_s28  ;;  %s223_s10 = sadd.s32 1, %s2868_s26 }
   0x6   : > { %p41_p0 = scmp.ge.s32.totalorder %s39_s9, 2  ;;  %p233_p1 = scmp.ne.s32.totalorder %s2868_s26, %s2864_s25 }
   0x7   : > { %p234_p2 = scmp.eq.s32.totalorder %s2513_s30, 1  ;;  %p239_p3 = scmp.ne.s32.totalorder %s2864_s25, %s2860_s24 }
   0x8   : > { %s3258_s9 = smov (%p41_p0, %s39_s9), 0  ;;  %p240_p5 = scmp.eq.s32.totalorder %s2514_s8, 1 }
   0x9   : > { %p2975_p4 = por %p234_p2, %p233_p1  ;;  %s218_s12 = ssub.s32 %s2876_s28, %s3258_s9 }
   0xa   : > { %p2517_p6 = scmp.ge.s32.totalorder %s2880_s29, 1  ;;  %p221_p7 = scmp.eq.s32.totalorder %s218_s12, 0 }
   0xb   : > { %p2982_p8 = por %p240_p5, %p239_p3  ;;  %p310_p9 = scmp.lt.s32.totalorder %s2880_s29, 3 }
   0xc   : > { %s2988_s14 = scalar_select %p221_p7, %s2868_s26, %s223_s10  }
   0xd   : > { %p311_p10 = pnand %p2517_p6, %p310_p9 }
   0xe   : > { %p368_p11 = scmp.lt.s32.totalorder (!%p311_p10), %s2872_s27, 1  ;;  %vm412_vm0 = vcmask (!%p311_p10), 64512   ;;  %v2882_v0 = vmov (!%p311_p10), 0.0   ;;  %vm2883_vm1 = vmmov (!%p311_p10), 0   ;;  %vm403_vm2 = vcmask (!%p311_p10), 7168   ;;  %s2891_s23 = smov (!%p311_p10), 8  }
   0xf   : > { %314 = sbr.rel (%p311_p10) target bundleno = 1937 (0x791), region = 48  ;;  %2598 = vmatprep.subr.mxu0 (!%p311_p10), %v2882_v0  ;;  %413 = vst.msk [vmem:[#allocation4] sm:$0xff] (!%p311_p10), %vm412_vm0, %v2882_v0  ;;  %414 = vst.msk [vmem:[#allocation4 + $0x8] sm:$0xff] (!%p311_p10), %vm412_vm0, %v2882_v0  ;;  %2600 = vmatprep.mubr.msk.f32.mxu0 (!%p311_p10), %vm2883_vm1, %v2882_v0  ;;  %v2884_v9 = vmov (!%p311_p10), -inf   ;;  %v1179_v10 = vlaneseq (!%p311_p10)  ;;  %v2885_v13 = vmov (!%p311_p10), -1e+30  }
  0x10   : > { %415 = vst.msk [vmem:[#allocation4 + $0x10] sm:$0xff] (!%p311_p10), %vm412_vm0, %v2882_v0  ;;  %416 = vst.msk [vmem:[#allocation4 + $0x18] sm:$0xff] (!%p311_p10), %vm412_vm0, %v2882_v0  ;;  %2603 = vmatprep.subr.mxu1 (!%p311_p10), %v2882_v0  ;;  %2605 = vmatprep.mubr.msk.f32.mxu1 (!%p311_p10), %vm2883_vm1, %v2882_v0  ;;  %v2886_v31 = vmov (!%p311_p10), 0   ;;  %s2892_s30 = smov (!%p311_p10), 24   ;;  %vm2105_vm4 = vcmask (!%p311_p10), 130048   ;;  %vm2107_vm5 = vcmask (!%p311_p10), 195584  }
  0x11   : > { %404 = vst.msk [vmem:[#allocation2] sm:$0xff] (!%p311_p10), %vm403_vm2, %v2884_v9  ;;  %405 = vst.msk [vmem:[#allocation2 + $0x8] sm:$0xff] (!%p311_p10), %vm403_vm2, %v2884_v9  ;;  %v3051_v11 = vshrl.u32 (!%p311_p10), %v1179_v10, 7  ;;  %v1182_v12 = vand.u32 (!%p311_p10), 127, %v1179_v10  ;;  %2770 = vset.pattern.permute.xlu0 (!%p311_p10), %v2886_v31  ;;  %2771 = vset.pattern.permute.xlu1 (!%p311_p10), %v2886_v31  ;;  %vm2113_vm6 = vcmask (!%p311_p10), 261120   ;;  %s2893_s12 = smov (!%p311_p10), 64  }
  0x12   : > { %406 = vst.msk [vmem:[#allocation2 + $0x10] sm:$0xff] (!%p311_p10), %vm403_vm2, %v2884_v9  ;;  %407 = vst.msk [vmem:[#allocation2 + $0x18] sm:$0xff] (!%p311_p10), %vm403_vm2, %v2884_v9  ;;  %vm2294_vm7 = vcmask (!%p311_p10), 523264   ;;  %s2557_s18 = sshll.u32 (!%p311_p10), %s2872_s27, 7 }
  0x13   : > { %408 = vst.msk [vmem:[#allocation3] sm:$0xff] (!%p311_p10), %vm403_vm2, %v2882_v0  ;;  %409 = vst.msk [vmem:[#allocation3 + $0x8] sm:$0xff] (!%p311_p10), %vm403_vm2, %v2882_v0  ;;  %vm1183_vm3 = vcmp.le.s32.totalorder (!%p311_p10), %v1182_v12, %v3051_v11 }
  0x14   : > { %410 = vst.msk [vmem:[#allocation3 + $0x10] sm:$0xff] (!%p311_p10), %vm403_vm2, %v2882_v0  ;;  %411 = vst.msk [vmem:[#allocation3 + $0x18] sm:$0xff] (!%p311_p10), %vm403_vm2, %v2882_v0  ;;  %v1184_v14 = vsel (!%p311_p10), %vm1183_vm3, 0.0, %v2885_v13 }
  0x16   : > { %s3003_s15 = scalar_select %p368_p11, %s2872_s27, 1 }
  0x17   : > { %s2894_s27 = smov [#allocation5]  }
  0x18   : > { %s3009_s16 = sshll.u32 %s3003_s15, 5  ;;  %v3058_v32 = vld [vmem:[#allocation2] sm:$0xff]  ;;  %v3063_v35 = vld [vmem:[#allocation2 + $0x8] sm:$0xff] }
  0x19   : > { %s390_s19 = scalar_lea.vmem %s3244_s2, %s3009_s16  ;;  %s382_s22 = scalar_lea.vmem %s3243_s1, %s3009_s16  ;;  %v3065_v36 = vld [vmem:[#allocation2 + $0x10] sm:$0xff]  ;;  %v3076_v42 = vld [vmem:[#allocation2 + $0x18] sm:$0xff] }
  0x1a   : > { %v1171_v1 = vld [vmem:[%s390_s19] sm:$0xff]  ;;  %v1172_v2 = vld [vmem:[%s390_s19 + $0x8] sm:$0xff]  ;;  %v1173_v5 = vld [vmem:[%s390_s19 + $0x10] sm:$0xff]  ;;  %s398_s8 = scalar_lea.vmem %s3245_s3, %s3009_s16 }
  0x1b   : > { %2599 = vmatpush3.xpose.msk.msra.mxu0 %vm412_vm0, %v1171_v1  ;;  %v1167_v3 = vld [vmem:[%s382_s22] sm:$0xff]  ;;  %2604 = vmatpush3.xpose.msk.msra.mxu1 %vm412_vm0, %v1172_v2  ;;  %v1168_v4 = vld [vmem:[%s382_s22 + $0x8] sm:$0xff]  ;;  %v1174_v6 = vld [vmem:[%s390_s19 + $0x18] sm:$0xff] }
  0x1c   : > { %2608 = vmatprep.subr.mxu0 %v2882_v0  ;;  %2613 = vmatprep.subr.mxu1 %v2882_v0  ;;  %v1169_v7 = vld [vmem:[%s382_s22 + $0x10] sm:$0xff]  ;;  %v1170_v8 = vld [vmem:[%s382_s22 + $0x18] sm:$0xff]  ;;  %v1175_v48 = vld [vmem:[%s398_s8] sm:$0xff]  ;;  %s2890_s22 = smov 16  }
  0x1d   : > { %v1176_v49 = vld [vmem:[%s398_s8 + $0x8] sm:$0xff]  ;;  %v1177_v61 = vld [vmem:[%s398_s8 + $0x10] sm:$0xff]  ;;  %v1178_v2 = vld [vmem:[%s398_s8 + $0x18] sm:$0xff]  ;;  %s2519_s8 = sshll.u32 %s3003_s15, 3 }
  0x1e   : > { %2601 = vmatmul.mubr.msk.f32.vlgmr.msra.gmra.mrb[0].mxu0 %vm412_vm0, %v1167_v3  ;;  %2606 = vmatmul.mubr.msk.f32.vlgmr.msra.gmra.mrb[0].mxu1 %vm412_vm0, %v1168_v4  ;;  %s374_s16 = scalar_lea.vmem %s3242_s0, %s2519_s8  ;;  %s2806_s8 = sshll.u32 %s2894_s27, 4  ;;  %s2807_s8 = int_to_ptr.vmem [resolvable:$false] %s2806_s8 }
  0x1f   : > { %2609 = vmatpush3.xpose.msk.msra.mxu0 %vm412_vm0, %v1173_v5  ;;  %2610 = vmatprep.mubr.msk.f32.mxu0 %vm2883_vm1, %v2882_v0  ;;  %s2808_s10 = scalar_lea.vmem %s2807_s8, 256 }
  0x20   : > { %2614 = vmatpush3.xpose.msk.msra.mxu1 %vm412_vm0, %v1174_v6  ;;  %2615 = vmatprep.mubr.msk.f32.mxu1 %vm2883_vm1, %v2882_v0 }
  0x21   : > { %2618 = vmatprep.subr.mxu0 %v2882_v0  ;;  %2623 = vmatprep.subr.mxu1 %v2882_v0 }
  0x22   : > { %2611 = vmatmul.mubr.msk.f32.vlgmr.msra.gmra.mrb[2].mxu0 %vm412_vm0, %v1169_v7 }
  0x23   : > { %2616 = vmatmul.mubr.msk.f32.vlgmr.msra.gmra.mrb[2].mxu1 %vm412_vm0, %v1170_v8  ;;  %2620 = vmatprep.mubr.msk.f32.mxu0 %vm2883_vm1, %v2882_v0 }
  0x24   : > { %2625 = vmatprep.mubr.msk.f32.mxu1 %vm2883_vm1, %v2882_v0  ;;  %2619 = vmatpush3.msra.mxu0 %v1175_v48 }
  0x25   : > { %2628 = vmatprep.subr.mxu0 %v2882_v0  ;;  %2624 = vmatpush3.msra.mxu1 %v1176_v49  ;;  %v1584_v49 = vld [vmem:[#allocation4 + $0x8] sm:$0xff] }
  0x26   : > { %2633 = vmatprep.subr.mxu1 %v2882_v0 }
  0xf1   : > { %v1258_v15 = vpop.f32.mrb[0].mxu0  ;;  %v1334_v16 = vpop.f32.mrb[0].mxu1 }
  0xf2   : > { %v1259_v17 = vadd.f32 %v1258_v15, %v1184_v14  ;;  %v2602_v18 = vpop.f32.mrb[1].mxu0  ;;  %v1335_v19 = vadd.f32 %v1334_v16, %v1184_v14  ;;  %v2607_v20 = vpop.f32.mrb[1].mxu1 }
  0xf3   : > { %v1554_v18 = vld [vmem:[#allocation3] sm:$0xff] }
  0xf4   : > { %v1494_v21 = vsel %vm412_vm0, %v1259_v17, -inf  ;;  %v1497_v24 = vsel %vm412_vm0, %v1335_v19, -inf }
  0xf5   : > { %1495 = vmax.xlane.f32.xlu0 %v1494_v21  ;;  %v1410_v22 = vpop.f32.mrb[2].mxu0  ;;  %v1555_v21 = vld [vmem:[#allocation3 + $0x8] sm:$0xff] }
  0xf6   : > { %v1411_v23 = vadd.f32 %v1410_v22, %v1184_v14  ;;  %v2612_v25 = vpop.f32.mrb[3].mxu0  ;;  %v1486_v26 = vpop.f32.mrb[2].mxu1 }
  0xf7   : > { %v1487_v27 = vadd.f32 %v1486_v26, %v1184_v14  ;;  %v2617_v28 = vpop.f32.mrb[3].mxu1  ;;  %v1556_v25 = vld [vmem:[#allocation3 + $0x10] sm:$0xff] }
  0xf8   : > { %v1500_v29 = vsel %vm412_vm0, %v1411_v23, -inf }
  0xf9   : > { %1498 = vmax.xlane.f32.xlu0 %v1497_v24  ;;  %1501 = vmax.xlane.f32.xlu1 %v1500_v29  ;;  %v1503_v30 = vsel %vm412_vm0, %v1487_v27, -inf  ;;  %v1557_v29 = vld [vmem:[#allocation3 + $0x18] sm:$0xff] }
  0xfd   : > { %1504 = vmax.xlane.f32.xlu1 %v1503_v30 }
 0x182   : > { %v1496_v33 = vpop.xlane.xlu0 %1495 }
 0x183   : > { %v3061_v34 = vmax.f32 %v3058_v32, %v1496_v33 }
 0x185   : > { %v1510_v37 = vsub.f32 %v3058_v32, %v3061_v34  ;;  %1911 = vst.msk [vmem:[#allocation2] sm:$0xff] %vm403_vm2, %v3061_v34  ;;  %1524 = vperm.xlu0 %2770, %v3061_v34  }
 0x186   : > { %v1499_v38 = vpop.xlane.xlu0 %1498  ;;  %v1502_v39 = vpop.xlane.xlu1 %1501 }
 0x187   : > { %v1507_v40 = vmax.f32 %v3063_v35, %v1499_v38  ;;  %v3074_v41 = vmax.f32 %v3065_v36, %v1502_v39  ;;  %v1514_v10 = vmul.f32 1.442695, %v1510_v37 }
 0x189   : > { %v1511_v43 = vsub.f32 %v3063_v35, %v1507_v40  ;;  %1912 = vst.msk [vmem:[#allocation2 + $0x8] sm:$0xff] %vm403_vm2, %v1507_v40  ;;  %1529 = vperm.xlu1 %2771, %v1507_v40   ;;  %v1512_v44 = vsub.f32 %v3065_v36, %v3074_v41  ;;  %1913 = vst.msk [vmem:[#allocation2 + $0x10] sm:$0xff] %vm403_vm2, %v3074_v41 }
 0x18a   : > { %v1505_v45 = vpop.xlane.xlu1 %1504 }
 0x18b   : > { %v1509_v46 = vmax.f32 %v3076_v42, %v1505_v45  ;;  %v1516_v8 = vmul.f32 1.442695, %v1511_v43  ;;  %v1518_v12 = vmul.f32 1.442695, %v1512_v44  ;;  %v2110_v43 = vld [vmem:[%s3246_s4 + $0x8] sm:$0xff]  ;;  %v2887_v44 = vmov 0.0|0.0  }
 0x18d   : > { %1534 = vperm.xlu1 %2771, %v3074_v41   ;;  %v1513_v47 = vsub.f32 %v3076_v42, %v1509_v46  ;;  %1914 = vst.msk [vmem:[#allocation2 + $0x18] sm:$0xff] %vm403_vm2, %v1509_v46  ;;  %v2109_v42 = vld [vmem:[%s3246_s4] sm:$0xff] }
 0x18e   : > { %v2680_v45 = vpack.c.bf16 %v2110_v43, %v2109_v42 }
 0x18f   : > { %v1520_v13 = vmul.f32 1.442695, %v1513_v47 }
 0x191   : > { %1539 = vperm.xlu1 %2771, %v1509_v46   ;;  %v1583_v46 = vld [vmem:[#allocation4] sm:$0xff] }
 0x204   : > { %v1525_v50 = vpop.permute.xlu0 %1524 }
 0x205   : > { %v1542_v51 = vsub.f32 %v1259_v17, %v1525_v50 }
 0x207   : > { %v1546_v52 = vmul.f32 1.442695, %v1542_v51 }
 0x208   : > { %v1530_v53 = vpop.permute.xlu1 %1529 }
 0x209   : > { %2772 = vpow2.f32 %v1546_v52  ;;  %v1543_v54 = vsub.f32 %v1335_v19, %v1530_v53 }
 0x20b   : > { %v1548_v55 = vmul.f32 1.442695, %v1543_v54 }
 0x20c   : > { %v1535_v56 = vpop.permute.xlu1 %1534 }
 0x20d   : > { %2774 = vpow2.f32 %v1548_v55  ;;  %v1544_v57 = vsub.f32 %v1411_v23, %v1535_v56  ;;  %v1585_v56 = vld [vmem:[#allocation4 + $0x10] sm:$0xff] }
 0x20f   : > { %v1550_v58 = vmul.f32 1.442695, %v1544_v57 }
 0x210   : > { %v1540_v59 = vpop.permute.xlu1 %1539 }
 0x211   : > { %2776 = vpow2.f32 %v1550_v58  ;;  %v1545_v60 = vsub.f32 %v1487_v27, %v1540_v59 }
 0x213   : > { %v2773_v62 = vpop.eup %2772  ;;  %v1552_v63 = vmul.f32 1.442695, %v1545_v60 }
 0x214   : > { %2621 = vmatmul.mubr.msk.f32.vlgmr.msra.gmra.mrb[4].mxu0 %vm412_vm0, %v2773_v62  ;;  %v1562_v1 = vsel %vm412_vm0, %v2773_v62, 0.0 }
 0x215   : > { %2778 = vpow2.f32 %v1552_v63  ;;  %1563 = vadd.xlane.f32.xlu1 %v1562_v1  ;;  %2629 = vmatpush3.msra.mxu0 %v1177_v61  ;;  %v1586_v61 = vld [vmem:[#allocation4 + $0x18] sm:$0xff] }
 0x216   : > { %2630 = vmatprep.mubr.msk.f32.mxu0 %vm2883_vm1, %v2882_v0  ;;  %2780 = vpow2.f32 %v1516_v8  ;;  %2691 = vmatprep.subr.bf16.mxu0 %v2887_v44 }
 0x217   : > { %v2775_v3 = vpop.eup %2774  ;;  %2782 = vpow2.f32 %v1514_v10 }
 0x218   : > { %2626 = vmatmul.mubr.msk.f32.vlgmr.msra.gmra.mrb[4].mxu1 %vm412_vm0, %v2775_v3  ;;  %v1565_v4 = vsel %vm412_vm0, %v2775_v3, 0.0  ;;  %2784 = vpow2.f32 %v1518_v12  ;;  %v2889_v12 = vmov 1934713408  }
 0x219   : > { %1566 = vadd.xlane.f32.xlu0 %v1565_v4  ;;  %2634 = vmatpush3.msra.mxu1 %v1178_v2  ;;  %2786 = vpow2.f32 %v1520_v13  ;;  %v1991_v13 = vunpack.c.l.s4 %v2889_v12 }
 0x21a   : > { %2635 = vmatprep.mubr.msk.f32.mxu1 %vm2883_vm1, %v2882_v0  ;;  %2679 = vmatprep.subr.bf16.mxu1 %v2887_v44 }
 0x21b   : > { %v2777_v5 = vpop.eup %2776 }
 0x21c   : > { %2631 = vmatmul.mubr.msk.f32.vlgmr.msra.gmra.mrb[6].mxu0 %vm412_vm0, %v2777_v5  ;;  %v1568_v6 = vsel %vm412_vm0, %v2777_v5, 0.0 }
 0x21d   : > { %1569 = vadd.xlane.f32.xlu1 %v1568_v6  ;;  %2676 = vmatprep.mubr.msk.f32.mxu0 %vm2883_vm1, %v2882_v0 }
 0x21f   : > { %v2779_v7 = vpop.eup %2778 }
 0x220   : > { %2636 = vmatmul.mubr.msk.f32.vlgmr.msra.gmra.mrb[6].mxu1 %vm412_vm0, %v2779_v7  ;;  %v1571_v9 = vsel %vm412_vm0, %v2779_v7, 0.0  ;;  %v2781_v14 = vpop.eup %2780  ;;  %v2888_v7 = vmov 1983009808  }
 0x221   : > { %1572 = vadd.xlane.f32.xlu1 %v1571_v9  ;;  %2646 = vmatprep.mubr.msk.f32.mxu1 %vm2883_vm1, %v2882_v0  ;;  %v2783_v15 = vpop.eup %2782  ;;  %v1559_v23 = vmul.f32 %v2781_v14, %v1555_v21  ;;  %v1959_v8 = vunpack.c.l.s4 %v2888_v7  ;;  %v1992_v21 = vunpack.c.0.s8 %v1991_v13 }
 0x222   : > { %v2785_v16 = vpop.eup %2784  ;;  %v1558_v19 = vmul.f32 %v2783_v15, %v1554_v18  ;;  %2681 = vmatpush3.bf16.msra.mxu1 %v2680_v45 }
 0x223   : > { %v2787_v17 = vpop.eup %2786  ;;  %v1560_v27 = vmul.f32 %v2785_v16, %v1556_v25  ;;  %2682 = vmatprep.subr.bf16.mxu1 %v2887_v44  ;;  %v1960_v10 = vunpack.c.0.s8 %v1959_v8 }
 0x224   : > { %v1561_v32 = vmul.f32 %v2787_v17, %v1557_v29 }
 0x22f   : > { %1594 = vperm.xlu0 %2770, %v2781_v14  }
 0x232   : > { %1589 = vperm.xlu1 %2771, %v2783_v15  }
 0x236   : > { %1599 = vperm.xlu1 %2771, %v2785_v16  }
 0x23a   : > { %1604 = vperm.xlu1 %2771, %v2787_v17  }
 0x2a2   : > { %v1564_v20 = vpop.xlane.xlu1 %1563 }
 0x2a3   : > { %v1574_v22 = vadd.f32 %v1564_v20, %v1558_v19  ;;  %v1963_v20 = vsub.s32 %v1960_v10, %v3051_v11  ;;  %v1915_v10 = vld [vmem:[%s374_s16] sm:$0xff]  ;;  %s365_s16 = sand.u32 1, %s2864_s25  }
 0x2a4   : > { %s2518_s17 = sshll.u32 %s365_s16, 3 }
 0x2a5   : > { %1579 = vst.msk [vmem:[#allocation3] sm:$0xff] %vm403_vm2, %v1574_v22  ;;  %s367_s19 = scalar_lea.vmem [#allocation5], %s2518_s17 }
 0x2a6   : > { %v1567_v24 = vpop.xlane.xlu0 %1566  ;;  %s2385_s20 = sshll.u32 %s367_s19, 4  ;;  %s3196_s20 = int_to_ptr.vmem [resolvable:$true] %s2385_s20 }
 0x2a7   : > { %v1575_v26 = vadd.f32 %v1567_v24, %v1559_v23  ;;  %p2809_p1 = scmp.lt.s32.totalorder %s3196_s20, %s2807_s8 }
 0x2a9   : > { %1580 = vst.msk [vmem:[#allocation3 + $0x8] sm:$0xff] %vm403_vm2, %v1575_v26 }
 0x2aa   : > { %v1570_v28 = vpop.xlane.xlu1 %1569 }
 0x2ab   : > { %v1576_v30 = vadd.f32 %v1570_v28, %v1560_v27 }
 0x2ac   : > { %v1920_v31 = vld [vmem:[#allocation3] sm:$0xff] }
 0x2ad   : > { %1581 = vst.msk [vmem:[#allocation3 + $0x10] sm:$0xff] %vm403_vm2, %v1576_v30  ;;  %2788 = vrcp.f32 %v1920_v31  ;;  %v1995_v31 = vsub.s32 %v1992_v21, %v3051_v11 }
 0x2ae   : > { %v1573_v33 = vpop.xlane.xlu1 %1572  ;;  %v1595_v50 = vpop.permute.xlu0 %1594 }
 0x2af   : > { %v1577_v34 = vadd.f32 %v1573_v33, %v1561_v32  ;;  %v1608_v55 = vmul.f32 %v1595_v50, %v1584_v49 }
 0x2b0   : > { %v1921_v35 = vld [vmem:[#allocation3 + $0x8] sm:$0xff] }
 0x2b1   : > { %1582 = vst.msk [vmem:[#allocation3 + $0x18] sm:$0xff] %vm403_vm2, %v1577_v34  ;;  %2790 = vrcp.f32 %v1921_v35 }
 0x2b2   : > { %v1590_v47 = vpop.permute.xlu1 %1589 }
 0x2b3   : > { %v1607_v48 = vmul.f32 %v1590_v47, %v1583_v46 }
 0x2b4   : > { %v1922_v36 = vld [vmem:[#allocation3 + $0x10] sm:$0xff] }
 0x2b5   : > { %2792 = vrcp.f32 %v1922_v36 }
 0x2b6   : > { %v1600_v54 = vpop.permute.xlu1 %1599 }
 0x2b7   : > { %v2789_v37 = vpop.eup %2788  ;;  %v1609_v60 = vmul.f32 %v1600_v54, %v1585_v56 }
 0x2b8   : > { %1934 = vperm.xlu1 %2771, %v2789_v37   ;;  %v1923_v38 = vld [vmem:[#allocation3 + $0x18] sm:$0xff] }
 0x2b9   : > { %2794 = vrcp.f32 %v1923_v38 }
 0x2ba   : > { %v1605_v62 = vpop.permute.xlu1 %1604 }
 0x2bb   : > { %v2791_v39 = vpop.eup %2790  ;;  %v1610_v3 = vmul.f32 %v1605_v62, %v1586_v61 }
 0x2bc   : > { %1939 = vperm.xlu0 %2770, %v2791_v39  }
 0x2bf   : > { %v2793_v40 = vpop.eup %2792 }
 0x2c0   : > { %1944 = vperm.xlu1 %2771, %v2793_v40   ;;  %v2111_v40 = vld [vmem:[%s3246_s4 + $0x10] sm:$0xff] }
 0x2c3   : > { %v2795_v41 = vpop.eup %2794 }
 0x2c4   : > { %1949 = vperm.xlu0 %2770, %v2795_v41   ;;  %v2112_v41 = vld [vmem:[%s3246_s4 + $0x18] sm:$0xff] }
 0x2c5   : > { %v2683_v42 = vpack.c.bf16 %v2112_v41, %v2111_v40 }
 0x2c7   : > { %2684 = vmatpush3.bf16.msra.mxu1 %v2683_v42 }
 0x2c8   : > { %2685 = vmatprep.subr.bf16.mxu1 %v2887_v44 }
 0x2e7   : > { %v1680_v51 = vpop.f32.mrb[4].mxu0 }
 0x2e8   : > { %v1903_v52 = vadd.f32 %v1680_v51, %v1607_v48  ;;  %v2622_v53 = vpop.f32.mrb[5].mxu0 }
 0x2ea   : > { %1907 = vst.msk [vmem:[#allocation4] sm:$0xff] %vm412_vm0, %v1903_v52 }
 0x2eb   : > { %v1753_v57 = vpop.f32.mrb[4].mxu1 }
 0x2ec   : > { %v1904_v58 = vadd.f32 %v1753_v57, %v1608_v55  ;;  %v2627_v59 = vpop.f32.mrb[5].mxu1 }
 0x2ee   : > { %1908 = vst.msk [vmem:[#allocation4 + $0x8] sm:$0xff] %vm412_vm0, %v1904_v58 }
 0x2ef   : > { %v1826_v63 = vpop.f32.mrb[6].mxu0 }
 0x2f0   : > { %v1905_v1 = vadd.f32 %v1826_v63, %v1609_v60  ;;  %v2632_v2 = vpop.f32.mrb[7].mxu0 }
 0x2f1   : > { %v1916_v18 = vld [vmem:[#allocation4] sm:$0xff] }
 0x2f2   : > { %1909 = vst.msk [vmem:[#allocation4 + $0x10] sm:$0xff] %vm412_vm0, %v1905_v1 }
 0x2f3   : > { %v1899_v4 = vpop.f32.mrb[6].mxu1 }
 0x2f4   : > { %v1906_v5 = vadd.f32 %v1899_v4, %v1610_v3  ;;  %v2637_v6 = vpop.f32.mrb[7].mxu1 }
 0x2f5   : > { %v1917_v22 = vld [vmem:[#allocation4 + $0x8] sm:$0xff] }
 0x2f6   : > { %1910 = vst.msk [vmem:[#allocation4 + $0x18] sm:$0xff] %vm412_vm0, %v1906_v5 }
 0x2f9   : > { %v1918_v16 = vld [vmem:[#allocation4 + $0x10] sm:$0xff] }
 0x2fd   : > { %v1919_v24 = vld [vmem:[#allocation4 + $0x18] sm:$0xff] }
 0x337   : > { %v1935_v9 = vpop.permute.xlu1 %1934 }
 0x338   : > { %v1952_v19 = vmul.f32 %v1935_v9, %v1916_v18 }
 0x33b   : > { %v1940_v14 = vpop.permute.xlu0 %1939 }
 0x33c   : > { %v1953_v25 = vmul.f32 %v1940_v14, %v1917_v22 }
 0x33f   : > { %v1945_v15 = vpop.permute.xlu1 %1944 }
 0x340   : > { %v1954_v17 = vmul.f32 %v1945_v15, %v1918_v16 }
 0x342   : > { %v1956_v26 = vcombine.low %v1952_v19, %v1954_v17  ;;  %v1957_v27 = vcombine.high %v1952_v19, %v1954_v17  ;;  %v2197_v17 = vld [vmem:[%s3247_s5] sm:$0xff]  ;;  %v2199_v19 = vld [vmem:[%s3247_s5 + $0x10] sm:$0xff] }
 0x343   : > { %v1950_v23 = vpop.permute.xlu0 %1949 }
 0x344   : > { %v1955_v28 = vmul.f32 %v1950_v23, %v1919_v24  ;;  %v1964_v32 = vrot.slane %v1956_v26, %v1963_v20  ;;  %v1971_v33 = vrot.slane %v1957_v27, %v1963_v20  ;;  %v2286_v27 = vld [vmem:[%s3248_s6] sm:$0xff] }
 0x346   : > { %v1972_v29 = vcombine.low %v1953_v25, %v1955_v28  ;;  %v1973_v30 = vcombine.high %v1953_v25, %v1955_v28  ;;  %v2287_v28 = vld [vmem:[%s3248_s6 + $0x8] sm:$0xff] }
 0x348   : > { %v1980_v34 = vrot.slane %v1972_v29, %v1963_v20  ;;  %v1987_v35 = vrot.slane %v1973_v30, %v1963_v20  ;;  %v2288_v29 = vld [vmem:[%s3248_s6 + $0x10] sm:$0xff]  ;;  %v2692_v30 = vpack.c.bf16 %v2287_v28, %v2286_v27 }
 0x34a   : > { %v1988_v36 = vcombine.low %v1964_v32, %v1980_v34  ;;  %v1989_v37 = vcombine.high %v1964_v32, %v1980_v34  ;;  %v2004_v38 = vcombine.low %v1971_v33, %v1987_v35  ;;  %v2005_v39 = vcombine.high %v1971_v33, %v1987_v35  ;;  %2693 = vmatpush3.bf16.msra.mxu0 %v2692_v30  ;;  %v2290_v33 = vld [vmem:[%s3248_s6 + $0x20] sm:$0xff]  ;;  %v2291_v34 = vld [vmem:[%s3248_s6 + $0x28] sm:$0xff] }
 0x34b   : > { %2694 = vmatprep.subr.bf16.mxu0 %v2887_v44  ;;  %v2698_v35 = vpack.c.bf16 %v2291_v34, %v2290_v33 }
 0x34c   : > { %v1996_v43 = vrot.slane %v1988_v36, %v1995_v31  ;;  %v2003_v45 = vrot.slane %v1989_v37, %v1995_v31  ;;  %v2012_v11 = vrot.slane %v2004_v38, %v1995_v31  ;;  %v2019_v46 = vrot.slane %v2005_v39, %v1995_v31  ;;  %v2292_v36 = vld [vmem:[%s3248_s6 + $0x30] sm:$0xff]  ;;  %v2293_v37 = vld [vmem:[%s3248_s6 + $0x38] sm:$0xff] }
 0x34d   : > { %v2701_v38 = vpack.c.bf16 %v2293_v37, %v2292_v36 }
 0x34e   : > { %v2024_v47 = vcombine.low %v1996_v43, %v2003_v45  ;;  %v2550_v48 = vcombine.high %v1996_v43, %v2003_v45  ;;  %v2040_v49 = vcombine.low %v2012_v11, %v2019_v46  ;;  %v2551_v50 = vcombine.high %v2012_v11, %v2019_v46 }
 0x350   : > { %v2031_v51 = vrot.slane %v2024_v47, %v1963_v20  ;;  %v2039_v52 = vrot.slane %v2550_v48, %v1963_v20  ;;  %v2047_v53 = vrot.slane %v2040_v49, %v1963_v20  ;;  %v2055_v54 = vrot.slane %v2551_v50, %v1963_v20  ;;  %v2200_v20 = vld [vmem:[%s3247_s5 + $0x18] sm:$0xff] }
 0x351   : > { %v2689_v21 = vpack.c.bf16 %v2200_v20, %v2199_v19 }
 0x352   : > { %v2057_v55 = vcombine.high %v2031_v51, %v2039_v52  ;;  %v2073_v56 = vcombine.high %v2047_v53, %v2055_v54  ;;  %v2056_v57 = vcombine.low %v2031_v51, %v2039_v52  ;;  %v2072_v58 = vcombine.low %v2047_v53, %v2055_v54 }
 0x354   : > { %v2071_v59 = vrot.slane %v2057_v55, %v1995_v31  ;;  %v2087_v60 = vrot.slane %v2073_v56, %v1995_v31  ;;  %v2064_v61 = vrot.slane %v2056_v57, %v1995_v31  ;;  %v2080_v62 = vrot.slane %v2072_v58, %v1995_v31  ;;  %v2289_v31 = vld [vmem:[%s3248_s6 + $0x18] sm:$0xff] }
 0x355   : > { %v2695_v32 = vpack.c.bf16 %v2289_v31, %v2288_v29 }
 0x356   : > { %v2090_v63 = vcombine.low %v2071_v59, %v2087_v60  ;;  %v2089_v1 = vcombine.high %v2064_v61, %v2080_v62  ;;  %v2088_v2 = vcombine.low %v2064_v61, %v2080_v62  ;;  %v2091_v3 = vcombine.high %v2071_v59, %v2087_v60 }
 0x357   : > { %2696 = vmatpush3.bf16.msra.mxu0 %v2695_v32 }
 0x358   : > { %2097 = vrot.lane.b32.xlu0 %v2090_v63, %s2890_s22  ;;  %2093 = vrot.lane.b32.xlu1 %v2089_v1, %s2891_s23  ;;  %s3194_s22 = scalar_lea.hbm %s3249_s7, %s2557_s18  ;;  %s2371_s23 = scalar_lea.sflag [#allocation6], %s365_s16 }
 0x359   : > { %2697 = vmatprep.subr.bf16.mxu0 %v2887_v44 }
 0x35b   : > { %2699 = vmatpush3.bf16.msra.mxu0 %v2698_v35 }
 0x35c   : > { %2101 = vrot.lane.b32.xlu1 %v2091_v3, %s2892_s30  ;;  %2700 = vmatprep.subr.bf16.mxu0 %v2887_v44  ;;  %s2802_s30 = scalar_lea.vmem %s3196_s20, 128 }
 0x35d   : > { %p2803_p12 = scmp.ne.s32.totalorder %s3196_s20, %s2802_s30  ;;  %p2810_p2 = scmp.lt.s32.totalorder %s2808_s10, %s2802_s30 }
 0x35f   : > { %2702 = vmatpush3.bf16.msra.mxu0 %v2701_v38  ;;  %p2804_p13 = pnand %p2803_p12, %p2975_p4  ;;  %p2811_p3 = por %p2810_p2, %p2809_p1 }
 0x361   : > { %p2805_p0 = pneg %p2804_p13 }
 0x363   : > { %p2812_p5 = pnand %p2811_p3, %p2805_p0 }
 0x3ca   : > { %v2094_v4 = vpop.permute.xlu1 %2093  ;;  %v2098_v5 = vpop.permute.xlu0 %2097 }
 0x3cb   : > { %v2104_v6 = vsel %vm412_vm0, %v2088_v2, %v2094_v4 }
 0x3cc   : > { %v2106_v8 = vsel %vm2105_vm4, %v2104_v6, %v2098_v5 }
 0x3ce   : > { %v2102_v7 = vpop.permute.xlu1 %2101 }
 0x3cf   : > { %v2108_v9 = vsel %vm2107_vm5, %v2106_v8, %v2102_v7 }
 0x3d0   : > { %2647 = vmatmul.mubr.msk.f32.vlgmr.msra.gmra.mrb[8].mxu1 %vm2113_vm6, %v2108_v9 }
 0x3d1   : > { %2657 = vmatprep.mubr.msk.f32.mxu1 %vm2883_vm1, %v2882_v0  ;;  %v2198_v0 = vld [vmem:[%s3247_s5 + $0x8] sm:$0xff] }
 0x3d2   : > { %v2686_v18 = vpack.c.bf16 %v2198_v0, %v2197_v17 }
 0x3d4   : > { %2687 = vmatpush3.bf16.msra.mxu1 %v2686_v18 }
 0x3d5   : > { %2688 = vmatprep.subr.bf16.mxu1 %v2887_v44 }
 0x3d8   : > { %2690 = vmatpush3.bf16.msra.mxu1 %v2689_v21 }
 0x4a3   : > { %v2183_v12 = vpop.f32.mrb[8].mxu1 }
 0x4a4   : > { %v2187_v13 = vadd.f32 %v2183_v12, %v1915_v10  ;;  %v2648_v14 = vpop.f32.mrb[9].mxu1 }
 0x4a6   : > { %v2188_v15 = vmul.f32 %v2187_v13, %v2187_v13 }
 0x4a8   : > { %v2189_v16 = vsel %vm2113_vm6, %v2188_v15, 0.0 }
 0x4a9   : > { %2190 = vadd.xlane.f32.xlu0 %v2189_v16 }
 0x536   : > { %v2191_v22 = vpop.xlane.xlu0 %2190 }
 0x537   : > { %v2193_v23 = vmul.f32 0.03125, %v2191_v22 }
 0x539   : > { %v2194_v24 = vadd.f32 1e-06, %v2193_v23 }
 0x53b   : > { %2796 = vrsqrt.f32 %v2194_v24 }
 0x545   : > { %v2797_v25 = vpop.eup %2796 }
 0x546   : > { %v2196_v26 = vmul.f32 %v2797_v25, %v2187_v13 }
 0x548   : > { %2658 = vmatmul.mubr.msk.f32.vlgmr.msra.gmra.mrb[10].mxu1 %vm2113_vm6, %v2196_v26 }
 0x61b   : > { %v2270_v39 = vpop.f32.mrb[10].mxu1 }
 0x61c   : > { %v2554_v40 = vmul.f32 -1.442695, %v2270_v39  ;;  %v2659_v41 = vpop.f32.mrb[11].mxu1 }
 0x61e   : > { %2798 = vpow2.f32 %v2554_v40 }
 0x628   : > { %v2799_v42 = vpop.eup %2798 }
 0x629   : > { %v2277_v43 = vadd.f32 1.0, %v2799_v42 }
 0x62b   : > { %2800 = vrcp.f32 %v2277_v43 }
 0x635   : > { %v2801_v45 = vpop.eup %2800 }
 0x636   : > { %v2280_v11 = vmul.f32 %v2801_v45, %v2270_v39 }
 0x638   : > { %2282 = vrot.lane.b32.xlu1 %v2280_v11, %s2893_s12 }
 0x6aa   : > { %v2283_v46 = vpop.permute.xlu1 %2282 }
 0x6ab   : > { %v2285_v47 = vmul.f32 %v2283_v46, %v2270_v39 }
 0x6ad   : > { %2677 = vmatmul.mubr.msk.f32.vlgmr.msra.gmra.mrb[8].mxu0 %vm2294_vm7, %v2285_v47 }
 0x780   : > { %v2364_v44 = vpop.f32.mrb[8].mxu0 }
 0x781   : > { %v2368_v48 = vadd.f32 %v2364_v44, %v2187_v13  ;;  %v2678_v49 = vpop.f32.mrb[9].mxu0 }
 0x783   : > { %2369 = vst.msk [vmem:[%s367_s19] sm:$0xff] %vm2113_vm6, %v2368_v48 }
 0x784   : > { %2815 = shalt.err (!%p2812_p5)
}
 0x785   : > { %s2816_s12 = scalar_lea.hbm %s3194_s22, 128  ;;  %s2820_s18 = scalar_lea.hbm %s3249_s7, 256 }
 0x786   : > { %p2817_p6 = scmp.ne.s32.totalorder %s3194_s22, %s2816_s12  ;;  %p2821_p10 = scmp.lt.u32.totalorder %s3194_s22, %s3249_s7 }
 0x787   : > { %p2822_p11 = scmp.lt.u32.totalorder %s2820_s18, %s2816_s12  ;;  %p2824_p13 = scmp.lt.u32.totalorder %s2816_s12, %s3194_s22 }
 0x788   : > { %p2818_p7 = pnand %p2817_p6, %p2975_p4 }
 0x789   : > { %p2823_p12 = por %p2822_p11, %p2821_p10 }
 0x78a   : > { %p2819_p9 = pneg %p2818_p7 }
 0x78b   : > { %p2825_p0 = por %p2824_p13, %p2823_p12 }
 0x78d   : > { %p2826_p1 = pnand %p2825_p0, %p2819_p9 }
 0x78f   : > { %2829 = shalt.err (!%p2826_p1)
}
 0x790   : > { %2703 = dma.vmem_to_hbm [thread:$0]  (%p2975_p4), %s3196_s20, 128, %s3194_s22, %s2371_s23  }
 0x791 PF: > { %p2709_p2 = scmp.ge.s32.totalorder %s2880_s29, 2  ;;  %s2397_s21 = sand.u32 1, %s2860_s24  }
 0x792   : > { %s2398_s30 = scalar_lea.sflag [#allocation6], %s2397_s21 }
 0x793   : > { %p2706_p3 = pnand %p2709_p2, %p2982_p8 }
 0x795   : > { %2855 = dma.done.wait (!%p2706_p3), %s2398_s30, 128  }
 0x796   : > { %2857 = vsyncadd (!%p2706_p3), %s2398_s30, 4294967168  ;;  %s20_s29 = sadd.s32 1, %s2880_s29   ;;  %s3252_s24 = smov %s2864_s25 }
 0x797   : > { %p17_p5 = scmp.ge.s32.totalorder %s20_s29, 4   ;;  %s3253_s25 = smov %s2868_s26 }
 0x798   : > { %s3254_s26 = smov %s2988_s14  ;;  %s3255_s27 = smov %s2876_s28 }
 0x799   : > { %s3256_s28 = smov %s3258_s9  ;;  %19 = sbr.rel (!%p17_p5) target bundleno = 4 (0x4), region = 104 }
 0x7a0   :  { %2403 = vsyncpa [#allocation6], 1 }
 0x7a1   :  { %2405 = vsyncpa [#allocation6 + $0x1], 1 }

</bundles_post_ra>
